<compile_context>
chip_gen: v6e
topology: v6e:2x2x1
jax: 0.10.0
libtpu: 0.0.40
codegen_flags: <defaults>
</compile_context>

<pallas_src>
import jax
import jax.numpy as jnp
from jax.experimental import pallas as pl
from jax.experimental.pallas import tpu as pltpu

EPS = 1e-5


def _bn_kernel(x_ref, gamma_ref, beta_ref, o_ref):
    # x_ref: (N, C, H*W) -- lane axis = H*W, sublane axis = C
    # gamma_ref / beta_ref: (1, C, 1)
    x = x_ref[...].astype(jnp.float32)
    n_red = x.shape[0] * x.shape[2]          # true element count per channel
    inv_n = 1.0 / n_red

    # First pass: per-channel mean (lane reduce, then trivial batch reduce).
    s = jnp.sum(x, axis=2, keepdims=True)    # (N, C, 1)
    s = jnp.sum(s, axis=0, keepdims=True)    # (1, C, 1)
    mean = s * inv_n

    # Second pass: centered variance (no E[x^2]-E[x]^2 cancellation).
    centered = x - mean
    ss = jnp.sum(centered * centered, axis=2, keepdims=True)
    ss = jnp.sum(ss, axis=0, keepdims=True)
    var = ss * inv_n                         # biased variance (matches PyTorch fwd)
    inv_std = jax.lax.rsqrt(var + EPS)

    # Fold affine: y = (x - mean) * (gamma * inv_std) + beta
    scale = gamma_ref[...] * inv_std         # (1, C, 1)
    o_ref[...] = (centered * scale + beta_ref[...]).astype(o_ref.dtype)


def batchnorm2d_pallas(x_nchw, gamma, beta):
    """Training-mode BatchNorm2d forward. x_nchw: (N, C, H, W)."""
    N, C, H, W = x_nchw.shape
    HW = H * W

    # Free reshape (no transpose): keep channels on sublanes, H*W on lanes.
    x3 = x_nchw.reshape(N, C, HW)
    gamma3 = gamma.reshape(1, C, 1).astype(jnp.float32)
    beta3 = beta.reshape(1, C, 1).astype(jnp.float32)

    y3 = pl.pallas_call(
        _bn_kernel,
        out_shape=jax.ShapeDtypeStruct((N, C, HW), x_nchw.dtype),
        grid=(1,),
        in_specs=[
            pl.BlockSpec((N, C, HW), lambda i: (0, 0, 0)),
            pl.BlockSpec((1, C, 1), lambda i: (0, 0, 0)),
            pl.BlockSpec((1, C, 1), lambda i: (0, 0, 0)),
        ],
        out_specs=pl.BlockSpec((N, C, HW), lambda i: (0, 0, 0)),
        compiler_params=pltpu.CompilerParams(
            dimension_semantics=("arbitrary",),
        ),
    )(x3, gamma3, beta3)

    return y3.reshape(N, C, H, W)


if __name__ == "__main__":
    key = jax.random.PRNGKey(0)
    kx, kg, kb = jax.random.split(key, 3)

    # Shape from the spec module: BatchNorm2d(168) on [1, 168, 28, 28].
    N, C, H, W = 1, 168, 28, 28
    x = jax.random.normal(kx, (N, C, H, W), dtype=jnp.float32)
    # PyTorch default affine params are ones/zeros; randomize to exercise the
    # affine path.
    gamma = jax.random.normal(kg, (C,), dtype=jnp.float32) * 0.1 + 1.0
    beta = jax.random.normal(kb, (C,), dtype=jnp.float32) * 0.1

    y = batchnorm2d_pallas(x, gamma, beta)
    y = jax.block_until_ready(y)

    # Pure-JAX reference (training-mode batch-stat normalization).
    mean = jnp.mean(x, axis=(0, 2, 3), keepdims=True)
    var = jnp.mean((x - mean) ** 2, axis=(0, 2, 3), keepdims=True)
    y_ref = (x - mean) / jnp.sqrt(var + EPS) * gamma.reshape(1, C, 1, 1) \
        + beta.reshape(1, C, 1, 1)
    assert jnp.allclose(y, y_ref, atol=1e-4, rtol=1e-4), "mismatch vs reference"

    # TODO(synk): running_mean/running_var momentum update (module state, not
    # part of the returned tensor) is not modeled here.
    print("KERNEL_OK")
</pallas_src>

<mosaic_0001>
module attributes {stable_mosaic.version = 11 : i64} {
  func.func @_bn_kernel(%arg0: i32, %arg1: memref<1x168x784xf32, #tpu.memory_space<vmem>>, %arg2: memref<1x168x1xf32, #tpu.memory_space<vmem>>, %arg3: memref<1x168x1xf32, #tpu.memory_space<vmem>>, %arg4: memref<1x168x784xf32, #tpu.memory_space<vmem>>) attributes {dimension_semantics = [#tpu.dimension_semantics<arbitrary>], iteration_bounds = array<i64: 1>, scalar_prefetch = 0 : i64, scratch_operands = 0 : i64, tpu.core_type = #tpu.core_type<tc>, window_params = [{pipeline_mode = #tpu.pipeline_mode<synchronous>, transform_indices = @transform_0, window_bounds = array<i64: 1, 168, 784>}, {pipeline_mode = #tpu.pipeline_mode<synchronous>, transform_indices = @transform_1, window_bounds = array<i64: 1, 168, 1>}, {pipeline_mode = #tpu.pipeline_mode<synchronous>, transform_indices = @transform_2, window_bounds = array<i64: 1, 168, 1>}, {pipeline_mode = #tpu.pipeline_mode<synchronous>, transform_indices = @transform_3, window_bounds = array<i64: 1, 168, 784>}]} {
    %c0 = arith.constant 0 : index
    %c0_0 = arith.constant 0 : index
    %c0_1 = arith.constant 0 : index
    %0 = vector.load %arg1[%c0, %c0_0, %c0_1] : memref<1x168x784xf32, #tpu.memory_space<vmem>>, vector<1x168x784xf32>
    %cst = arith.constant dense<0.000000e+00> : vector<1x168xf32>
    %1 = vector.multi_reduction <add>, %0, %cst [2] : vector<1x168x784xf32> to vector<1x168xf32>
    %2 = vector.shape_cast %1 : vector<1x168xf32> to vector<1x168x1xf32>
    %cst_2 = arith.constant dense<0.000000e+00> : vector<168x1xf32>
    %3 = vector.multi_reduction <add>, %2, %cst_2 [0] : vector<1x168x1xf32> to vector<168x1xf32>
    %4 = vector.shape_cast %3 : vector<168x1xf32> to vector<1x168x1xf32>
    %cst_3 = arith.constant 0.00127551018 : f32
    %5 = vector.broadcast %cst_3 : f32 to vector<1x168x1xf32>
    %6 = arith.mulf %4, %5 : vector<1x168x1xf32>
    %7 = vector.broadcast %6 : vector<1x168x1xf32> to vector<1x168x784xf32>
    %8 = arith.subf %0, %7 : vector<1x168x784xf32>
    %9 = arith.mulf %8, %8 : vector<1x168x784xf32>
    %cst_4 = arith.constant dense<0.000000e+00> : vector<1x168xf32>
    %10 = vector.multi_reduction <add>, %9, %cst_4 [2] : vector<1x168x784xf32> to vector<1x168xf32>
    %11 = vector.shape_cast %10 : vector<1x168xf32> to vector<1x168x1xf32>
    %cst_5 = arith.constant dense<0.000000e+00> : vector<168x1xf32>
    %12 = vector.multi_reduction <add>, %11, %cst_5 [0] : vector<1x168x1xf32> to vector<168x1xf32>
    %13 = vector.shape_cast %12 : vector<168x1xf32> to vector<1x168x1xf32>
    %cst_6 = arith.constant 0.00127551018 : f32
    %14 = vector.broadcast %cst_6 : f32 to vector<1x168x1xf32>
    %15 = arith.mulf %13, %14 : vector<1x168x1xf32>
    %cst_7 = arith.constant 9.99999974E-6 : f32
    %16 = vector.broadcast %cst_7 : f32 to vector<1x168x1xf32>
    %17 = arith.addf %15, %16 : vector<1x168x1xf32>
    %18 = math.rsqrt %17 : vector<1x168x1xf32>
    %c0_8 = arith.constant 0 : index
    %c0_9 = arith.constant 0 : index
    %c0_10 = arith.constant 0 : index
    %19 = vector.load %arg2[%c0_8, %c0_9, %c0_10] : memref<1x168x1xf32, #tpu.memory_space<vmem>>, vector<1x168x1xf32>
    %20 = arith.mulf %19, %18 : vector<1x168x1xf32>
    %21 = vector.broadcast %20 : vector<1x168x1xf32> to vector<1x168x784xf32>
    %22 = arith.mulf %8, %21 : vector<1x168x784xf32>
    %c0_11 = arith.constant 0 : index
    %c0_12 = arith.constant 0 : index
    %c0_13 = arith.constant 0 : index
    %23 = vector.load %arg3[%c0_11, %c0_12, %c0_13] : memref<1x168x1xf32, #tpu.memory_space<vmem>>, vector<1x168x1xf32>
    %24 = vector.broadcast %23 : vector<1x168x1xf32> to vector<1x168x784xf32>
    %25 = arith.addf %22, %24 : vector<1x168x784xf32>
    %c0_14 = arith.constant 0 : index
    %c0_15 = arith.constant 0 : index
    %c0_16 = arith.constant 0 : index
    %26 = vector.load %arg4[%c0_14, %c0_15, %c0_16] : memref<1x168x784xf32, #tpu.memory_space<vmem>>, vector<1x168x784xf32>
    tpu.vector_store %arg4[%c0_14, %c0_15, %c0_16], %25 {strides = array<i32>} : memref<1x168x784xf32, #tpu.memory_space<vmem>>, vector<1x168x784xf32>,
    return
  }
  func.func @transform_0(%arg0: i32) -> (i32, i32, i32) {
    %c0_i32 = arith.constant 0 : i32
    %c0_i32_0 = arith.constant 0 : i32
    %c0_i32_1 = arith.constant 0 : i32
    %c0_i32_2 = arith.constant 0 : i32
    return %c0_i32, %c0_i32_0, %c0_i32_1 : i32, i32, i32
  }
  func.func @transform_1(%arg0: i32) -> (i32, i32, i32) {
    %c0_i32 = arith.constant 0 : i32
    %c0_i32_0 = arith.constant 0 : i32
    %c0_i32_1 = arith.constant 0 : i32
    %c0_i32_2 = arith.constant 0 : i32
    return %c0_i32, %c0_i32_0, %c0_i32_1 : i32, i32, i32
  }
  func.func @transform_2(%arg0: i32) -> (i32, i32, i32) {
    %c0_i32 = arith.constant 0 : i32
    %c0_i32_0 = arith.constant 0 : i32
    %c0_i32_1 = arith.constant 0 : i32
    %c0_i32_2 = arith.constant 0 : i32
    return %c0_i32, %c0_i32_0, %c0_i32_1 : i32, i32, i32
  }
  func.func @transform_3(%arg0: i32) -> (i32, i32, i32) {
    %c0_i32 = arith.constant 0 : i32
    %c0_i32_0 = arith.constant 0 : i32
    %c0_i32_1 = arith.constant 0 : i32
    %c0_i32_2 = arith.constant 0 : i32
    return %c0_i32, %c0_i32_0, %c0_i32_1 : i32, i32, i32
  }
}

</mosaic_0001>

<bundles_post_ra>
// kernel: tpu_custom_call.1
= control target key start
LH: loop header
LB: loop body
LE: loop exit
PB: predicated region body
PF: predicated region fallthrough
CT: control target
= control target key end

     0   :  { %8 = vsyncpa [#allocation3], 0  ;;  %s3660_s0 = inlined_call_operand.hbm [shape: f32[1,168,784], index: 0, kind: input, shape index: {}]   ;;  %s3661_s1 = inlined_call_operand.vmem [shape: f32[1,168,1], index: 1, kind: input, shape index: {}]   ;;  %s3662_s2 = inlined_call_operand.vmem [shape: f32[1,168,1], index: 2, kind: input, shape index: {}]   ;;  %s3663_s3 = inlined_call_operand.hbm [shape: f32[1,168,784], index: 3, kind: output, shape index: {}]  }
   0x1   :  { %9 = vsyncpa [#allocation4], 0  ;;  %s1806_s12 = smov [#allocation2]  }
   0x2   :  { %s15_s13 = sshll.u32 %s1806_s12, 4  ;;  %s16_s13 = int_to_ptr.vmem [resolvable:$true] %s15_s13 }
   0x3   :  { %s1770_s14 = scalar_lea.vmem %s16_s13, 18816  ;;  %p1775_p1 = scmp.lt.s32.totalorder %s16_s13, %s16_s13 }
   0x4   :  { %p1771_p0 = scmp.ne.s32.totalorder %s16_s13, %s1770_s14  ;;  %p1776_p2 = scmp.lt.s32.totalorder %s1770_s14, %s1770_s14 }
   0x6   :  { %p1777_p3 = por %p1776_p2, %p1775_p1 }
   0x8   :  { %p1778_p4 = pnand %p1777_p3, %p1771_p0 }
   0xa   :  { %1781 = shalt.err (!%p1778_p4)
}
   0xb   :  { %s1807_s15 = smov 896   ;;  %s1808_s16 = smov 56  }
   0xc   :  { %21 = dma.hbm_to_vmem [thread:$0]  %s3660_s0, 18816, %s16_s13, [#allocation3], %s1807_s15, %s1807_s15, %s1808_s16  }
   0xd   :  { %1802 = dma.done.wait [#allocation3], 18816  }
   0xe   :  { %1803 = vsyncadd [#allocation3], 4294948480  ;;  %v1809_v0 = vmov 0   ;;  %v1837_v1 = vld [vmem:[#allocation2 + $0x70] sm:$0xff]  ;;  %v1839_v2 = vld [vmem:[#allocation2 + $0x78] sm:$0xff]  ;;  %vm181_vm0 = vcmask 130048  }
   0xf   :  { %1712 = vset.pattern.permute.xlu1 %v1809_v0  ;;  %1711 = vset.pattern.permute.xlu0 %v1809_v0  ;;  %v1841_v3 = vld [vmem:[#allocation2 + $0x80] sm:$0xff]  ;;  %v195_v4 = vadd.f32 %v1839_v2, %v1837_v1  ;;  %v1845_v5 = vld [vmem:[#allocation2 + $0x88] sm:$0xff]  ;;  %v1851_v8 = vld [vmem:[#allocation2 + $0x90] sm:$0xff] }
  0x10   :  { %v1847_v6 = vld [vmem:[#allocation2] sm:$0xff]  ;;  %v1849_v7 = vld [vmem:[#allocation2 + $0x8] sm:$0xff]  ;;  %v1854_v10 = vld [vmem:[#allocation2 + $0x10] sm:$0xff] }
  0x11   :  { %v196_v9 = vadd.f32 %v195_v4, %v1841_v3  ;;  %v176_v11 = vadd.f32 %v1849_v7, %v1847_v6  ;;  %v1858_v12 = vld [vmem:[#allocation2 + $0x98] sm:$0xff]  ;;  %v1864_v15 = vld [vmem:[#allocation2 + $0xa0] sm:$0xff]  ;;  %v1870_v19 = vld [vmem:[#allocation2 + $0x48] sm:$0xff] }
  0x12   :  { %v1860_v13 = vld [vmem:[#allocation2 + $0x18] sm:$0xff]  ;;  %v1868_v18 = vld [vmem:[#allocation2 + $0x40] sm:$0xff]  ;;  %v1874_v21 = vld [vmem:[#allocation2 + $0x30] sm:$0xff]  ;;  %v200_v29 = vsel %vm181_vm0, %v1864_v15, 0.0 }
  0x13   :  { %v1862_v14 = vld [vmem:[#allocation2 + $0x38] sm:$0xff]  ;;  %v197_v16 = vadd.f32 %v196_v9, %v1845_v5  ;;  %v177_v17 = vadd.f32 %v176_v11, %v1854_v10  ;;  %v1872_v20 = vld [vmem:[#allocation2 + $0x20] sm:$0xff]  ;;  %v1876_v22 = vld [vmem:[#allocation2 + $0x50] sm:$0xff]  ;;  %v182_v40 = vsel %vm181_vm0, %v1874_v21, 0.0 }
  0x14   :  { %v186_v23 = vadd.f32 %v1868_v18, %v1862_v14  ;;  %v1882_v26 = vld [vmem:[#allocation2 + $0xa8] sm:$0xff]  ;;  %v1884_v27 = vld [vmem:[#allocation2 + $0xb0] sm:$0xff]  ;;  %v1886_v28 = vld [vmem:[#allocation2 + $0xb8] sm:$0xff] }
  0x15   :  { %v198_v24 = vadd.f32 %v197_v16, %v1851_v8  ;;  %v178_v25 = vadd.f32 %v177_v17, %v1860_v13  ;;  %v1890_v30 = vld [vmem:[#allocation2 + $0x28] sm:$0xff]  ;;  %v1892_v31 = vld [vmem:[#allocation2 + $0x58] sm:$0xff]  ;;  %v204_v33 = vadd.f32 %v1884_v27, %v1882_v26  ;;  %v1899_v36 = vld [vmem:[#allocation2 + $0x60] sm:$0xff] }
  0x16   :  { %v187_v32 = vadd.f32 %v186_v23, %v1870_v19  ;;  %v1901_v37 = vld [vmem:[#allocation2 + $0xc0] sm:$0xff]  ;;  %v1905_v39 = vld [vmem:[#allocation2 + $0xe8] sm:$0xff]  ;;  %v1915_v45 = vld [vmem:[#allocation2 + $0xf0] sm:$0xff] }
  0x17   :  { %v199_v34 = vadd.f32 %v198_v24, %v1858_v12  ;;  %v179_v35 = vadd.f32 %v178_v25, %v1872_v20  ;;  %v1903_v38 = vld [vmem:[#allocation2 + $0xe0] sm:$0xff]  ;;  %v1909_v41 = vld [vmem:[#allocation2 + $0x68] sm:$0xff]  ;;  %v205_v44 = vadd.f32 %v204_v33, %v1886_v28  ;;  %v1920_v49 = vld [vmem:[#allocation2 + $0xd0] sm:$0xff] }
  0x18   :  { %v188_v42 = vadd.f32 %v187_v32, %v1876_v22  ;;  %v1912_v43 = vld [vmem:[#allocation2 + $0xc8] sm:$0xff]  ;;  %v213_v46 = vadd.f32 %v1905_v39, %v1903_v38  ;;  %v1922_v50 = vld [vmem:[#allocation2 + $0xf8] sm:$0xff]  ;;  %v1931_v56 = vld [vmem:[#allocation2 + $0x120] sm:$0xff]  ;;  %v191_v59 = vsel %vm181_vm0, %v1909_v41, 0.0 }
  0x19   :  { %v201_v47 = vadd.f32 %v200_v29, %v199_v34  ;;  %v180_v48 = vadd.f32 %v179_v35, %v1890_v30  ;;  %v1924_v51 = vld [vmem:[#allocation2 + $0x118] sm:$0xff]  ;;  %v206_v54 = vadd.f32 %v205_v44, %v1901_v37  ;;  %v1933_v57 = vld [vmem:[#allocation2 + $0x128] sm:$0xff]  ;;  %v1937_v60 = vld [vmem:[#allocation2 + $0x100] sm:$0xff] }
  0x1a   :  { %v189_v52 = vadd.f32 %v188_v42, %v1892_v31  ;;  %v1927_v53 = vld [vmem:[#allocation2 + $0xd8] sm:$0xff]  ;;  %v214_v55 = vadd.f32 %v213_v46, %v1915_v45  ;;  %3870 = vst [vmem:[#allocation8_spill] sm:$0xff] %v1933_v57  ;;  %v1939_v61 = vld [vmem:[#allocation2 + $0x110] sm:$0xff]  ;;  %v222_v63 = vadd.f32 %v1931_v56, %v1924_v51  ;;  %v1952_v17 = vld [vmem:[#allocation2 + $0x160] sm:$0xff] }
  0x1b   :  { %202 = vadd.xlane.f32.xlu1 %v201_v47  ;;  %v183_v58 = vadd.f32 %v182_v40, %v180_v48  ;;  %v1941_v62 = vld [vmem:[#allocation2 + $0x130] sm:$0xff]  ;;  %v207_v4 = vadd.f32 %v206_v54, %v1912_v43  ;;  %v1950_v16 = vld [vmem:[#allocation2 + $0x158] sm:$0xff]  ;;  %3874 = vst [vmem:[#allocation12_spill] sm:$0xff] %v1952_v17  ;;  %v209_v23 = vsel %vm181_vm0, %v1927_v53, 0.0  ;;  %v1956_v24 = vld [vmem:[#allocation2 + $0x108] sm:$0xff]  ;;  %v218_v47 = vsel %vm181_vm0, %v1939_v61, 0.0 }
  0x1c   :  { %3871 = vst [vmem:[#allocation9_spill] sm:$0xff] %v1941_v62  ;;  %v190_v0 = vadd.f32 %v189_v52, %v1899_v36  ;;  %v215_v9 = vadd.f32 %v214_v55, %v1922_v50  ;;  %v1948_v11 = vld [vmem:[#allocation2 + $0x150] sm:$0xff]  ;;  %3873 = vst [vmem:[#allocation11_spill] sm:$0xff] %v1950_v16  ;;  %v1958_v25 = vld [vmem:[#allocation2 + $0x138] sm:$0xff]  ;;  %v223_v29 = vadd.f32 %v222_v63, %v1933_v57 }
  0x1d   :  { %3872 = vst [vmem:[#allocation10_spill] sm:$0xff] %v1948_v11  ;;  %184 = vadd.xlane.f32.xlu0 %v183_v58  ;;  %3875 = vst [vmem:[#allocation13_spill] sm:$0xff] %v1958_v25  ;;  %v231_v32 = vadd.f32 %v1950_v16, %v1948_v11  ;;  %v208_v34 = vadd.f32 %v207_v4, %v1920_v49  ;;  %v1965_v40 = vld [vmem:[#allocation2 + $0x140] sm:$0xff]  ;;  %v1967_v42 = vld [vmem:[#allocation2 + $0x168] sm:$0xff] }
  0x1e   :  { %v192_v33 = vadd.f32 %v191_v59, %v190_v0  ;;  %v216_v35 = vadd.f32 %v215_v9, %v1937_v60  ;;  %3876 = vst [vmem:[#allocation14_spill] sm:$0xff] %v1965_v40  ;;  %3877 = vst [vmem:[#allocation15_spill] sm:$0xff] %v1967_v42  ;;  %v1969_v44 = vld [vmem:[#allocation2 + $0x188] sm:$0xff]  ;;  %v1971_v46 = vld [vmem:[#allocation2 + $0x190] sm:$0xff]  ;;  %v224_v52 = vadd.f32 %v223_v29, %v1941_v62 }
  0x1f   :  { %3878 = vst [vmem:[#allocation16_spill] sm:$0xff] %v1969_v44  ;;  %3879 = vst [vmem:[#allocation17_spill] sm:$0xff] %v1971_v46  ;;  %v1975_v48 = vld [vmem:[#allocation2 + $0x148] sm:$0xff]  ;;  %v1978_v54 = vld [vmem:[#allocation2 + $0x170] sm:$0xff]  ;;  %v232_v55 = vadd.f32 %v231_v32, %v1952_v17  ;;  %v240_v59 = vadd.f32 %v1971_v46, %v1969_v44  ;;  %v210_v63 = vadd.f32 %v209_v23, %v208_v34 }
  0x20   :  { %3880 = vst [vmem:[#allocation18_spill] sm:$0xff] %v1975_v48  ;;  %3881 = vst [vmem:[#allocation19_spill] sm:$0xff] %v1978_v54  ;;  %v1981_v58 = vld [vmem:[#allocation2 + $0x198] sm:$0xff]  ;;  %v217_v0 = vadd.f32 %v216_v35, %v1956_v24  ;;  %v1988_v9 = vld [vmem:[#allocation2 + $0x1a0] sm:$0xff]  ;;  %v225_v29 = vadd.f32 %v224_v52, %v1958_v25  ;;  %v227_v35 = vsel %vm181_vm0, %v1975_v48, 0.0 }
  0x21   :  { %3882 = vst [vmem:[#allocation20_spill] sm:$0xff] %v1981_v58  ;;  %v1986_v4 = vld [vmem:[#allocation2 + $0x178] sm:$0xff]  ;;  %3884 = vst [vmem:[#allocation22_spill] sm:$0xff] %v1988_v9  ;;  %v1990_v16 = vld [vmem:[#allocation2 + $0x1c0] sm:$0xff]  ;;  %193 = vadd.xlane.f32.xlu0 %v192_v33  ;;  %v233_v32 = vadd.f32 %v232_v55, %v1967_v42  ;;  %v241_v17 = vadd.f32 %v240_v59, %v1981_v58  ;;  %211 = vadd.xlane.f32.xlu1 %v210_v63 }
  0x22   :  { %3883 = vst [vmem:[#allocation21_spill] sm:$0xff] %v1986_v4  ;;  %3885 = vst [vmem:[#allocation23_spill] sm:$0xff] %v1990_v16  ;;  %v1993_v11 = vld [vmem:[#allocation2 + $0x180] sm:$0xff]  ;;  %v1997_v62 = vld [vmem:[#allocation2 + $0x1c8] sm:$0xff]  ;;  %v219_v34 = vadd.f32 %v218_v47, %v217_v0  ;;  %v226_v59 = vadd.f32 %v225_v29, %v1965_v40 }
  0x23   :  { %3886 = vst [vmem:[#allocation24_spill] sm:$0xff] %v1993_v11  ;;  %3887 = vst [vmem:[#allocation25_spill] sm:$0xff] %v1997_v62  ;;  %v1999_v23 = vld [vmem:[#allocation2 + $0x1d0] sm:$0xff]  ;;  %v2003_v46 = vld [vmem:[#allocation2 + $0x1a8] sm:$0xff]  ;;  %v249_v55 = vadd.f32 %v1997_v62, %v1990_v16  ;;  %v234_v58 = vadd.f32 %v233_v32, %v1978_v54  ;;  %v242_v44 = vadd.f32 %v241_v17, %v1988_v9  ;;  %v236_v42 = vsel %vm181_vm0, %v1993_v11, 0.0 }
  0x24   :  { %3888 = vst [vmem:[#allocation26_spill] sm:$0xff] %v1999_v23  ;;  %3889 = vst [vmem:[#allocation27_spill] sm:$0xff] %v2003_v46  ;;  %v2005_v33 = vld [vmem:[#allocation2 + $0x1b8] sm:$0xff]  ;;  %v2016_v47 = vld [vmem:[#allocation2 + $0x200] sm:$0xff]  ;;  %v228_v17 = vadd.f32 %v227_v35, %v226_v59 }
  0x25   :  { %3890 = vst [vmem:[#allocation28_spill] sm:$0xff] %v2005_v33  ;;  %v2007_v52 = vld [vmem:[#allocation2 + $0x1d8] sm:$0xff]  ;;  %3893 = vst [vmem:[#allocation31_spill] sm:$0xff] %v2016_v47  ;;  %v2018_v0 = vld [vmem:[#allocation2 + $0x208] sm:$0xff]  ;;  %v250_v62 = vadd.f32 %v249_v55, %v1999_v23  ;;  %220 = vadd.xlane.f32.xlu0 %v219_v34  ;;  %v235_v32 = vadd.f32 %v234_v58, %v1986_v4  ;;  %v243_v16 = vadd.f32 %v242_v44, %v2003_v46 }
  0x26   :  { %3891 = vst [vmem:[#allocation29_spill] sm:$0xff] %v2007_v52  ;;  %v2014_v63 = vld [vmem:[#allocation2 + $0x1f8] sm:$0xff]  ;;  %3894 = vst [vmem:[#allocation32_spill] sm:$0xff] %v2018_v0  ;;  %v2022_v48 = vld [vmem:[#allocation2 + $0x1b0] sm:$0xff]  ;;  %v245_v55 = vsel %vm181_vm0, %v2005_v33, 0.0  ;;  %229 = vadd.xlane.f32.xlu1 %v228_v17 }
  0x27   :  { %3892 = vst [vmem:[#allocation30_spill] sm:$0xff] %v2014_v63  ;;  %3895 = vst [vmem:[#allocation33_spill] sm:$0xff] %v2022_v48  ;;  %v2024_v25 = vld [vmem:[#allocation2 + $0x1e0] sm:$0xff]  ;;  %v258_v29 = vadd.f32 %v2016_v47, %v2014_v63  ;;  %v2031_v9 = vld [vmem:[#allocation2 + $0x1e8] sm:$0xff]  ;;  %v251_v34 = vadd.f32 %v250_v62, %v2007_v52  ;;  %v237_v47 = vadd.f32 %v236_v42, %v235_v32 }
  0x28   :  { %3896 = vst [vmem:[#allocation34_spill] sm:$0xff] %v2024_v25  ;;  %3897 = vst [vmem:[#allocation35_spill] sm:$0xff] %v2031_v9  ;;  %v2033_v54 = vld [vmem:[#allocation2 + $0x210] sm:$0xff]  ;;  %v2037_v40 = vld [vmem:[#allocation2 + $0x238] sm:$0xff]  ;;  %v244_v63 = vadd.f32 %v243_v16, %v2022_v48 }
  0x29   :  { %3898 = vst [vmem:[#allocation36_spill] sm:$0xff] %v2033_v54  ;;  %v2035_v11 = vld [vmem:[#allocation2 + $0x230] sm:$0xff]  ;;  %3900 = vst [vmem:[#allocation38_spill] sm:$0xff] %v2037_v40  ;;  %v2044_v35 = vld [vmem:[#allocation2 + $0x218] sm:$0xff]  ;;  %v259_v58 = vadd.f32 %v258_v29, %v2018_v0  ;;  %v252_v62 = vadd.f32 %v251_v34, %v2024_v25  ;;  %238 = vadd.xlane.f32.xlu0 %v237_v47 }
  0x2a   :  { %3899 = vst [vmem:[#allocation37_spill] sm:$0xff] %v2035_v11  ;;  %v2041_v23 = vld [vmem:[#allocation2 + $0x1f0] sm:$0xff]  ;;  %3902 = vst [vmem:[#allocation40_spill] sm:$0xff] %v2044_v35  ;;  %v2047_v44 = vld [vmem:[#allocation2 + $0x240] sm:$0xff]  ;;  %v267_v59 = vadd.f32 %v2037_v40, %v2035_v11  ;;  %v246_v16 = vadd.f32 %v245_v55, %v244_v63 }
  0x2b   :  { %3901 = vst [vmem:[#allocation39_spill] sm:$0xff] %v2041_v23  ;;  %3903 = vst [vmem:[#allocation41_spill] sm:$0xff] %v2047_v44  ;;  %v2052_v46 = vld [vmem:[#allocation2 + $0x220] sm:$0xff]  ;;  %v2054_v33 = vld [vmem:[#allocation2 + $0x248] sm:$0xff]  ;;  %v260_v29 = vadd.f32 %v259_v58, %v2033_v54  ;;  %v254_v42 = vsel %vm181_vm0, %v2041_v23, 0.0 }
  0x2c   :  { %3904 = vst [vmem:[#allocation42_spill] sm:$0xff] %v2052_v46  ;;  %3905 = vst [vmem:[#allocation43_spill] sm:$0xff] %v2054_v33  ;;  %v2056_v4 = vld [vmem:[#allocation2 + $0x268] sm:$0xff]  ;;  %v268_v0 = vadd.f32 %v267_v59, %v2047_v44  ;;  %v2063_v57 = vld [vmem:[#allocation2 + $0x270] sm:$0xff]  ;;  %v253_v59 = vadd.f32 %v252_v62, %v2031_v9  ;;  %247 = vadd.xlane.f32.xlu1 %v246_v16 }
  0x2d   :  { %3906 = vst [vmem:[#allocation44_spill] sm:$0xff] %v2056_v4  ;;  %v2059_v52 = vld [vmem:[#allocation2 + $0x228] sm:$0xff]  ;;  %3908 = vst [vmem:[#allocation46_spill] sm:$0xff] %v2063_v57  ;;  %v2065_v17 = vld [vmem:[#allocation2 + $0x278] sm:$0xff]  ;;  %v276_v58 = vadd.f32 %v2063_v57, %v2056_v4  ;;  %v261_v44 = vadd.f32 %v260_v29, %v2044_v35 }
  0x2e   :  { %3907 = vst [vmem:[#allocation45_spill] sm:$0xff] %v2059_v52  ;;  %3909 = vst [vmem:[#allocation47_spill] sm:$0xff] %v2065_v17  ;;  %v2069_v32 = vld [vmem:[#allocation2 + $0x250] sm:$0xff]  ;;  %v2071_v40 = vld [vmem:[#allocation2 + $0x260] sm:$0xff]  ;;  %v269_v11 = vadd.f32 %v268_v0, %v2054_v33  ;;  %v263_v54 = vsel %vm181_vm0, %v2059_v52, 0.0  ;;  %v255_v0 = vadd.f32 %v254_v42, %v253_v59 }
  0x2f   :  { %3910 = vst [vmem:[#allocation48_spill] sm:$0xff] %v2069_v32  ;;  %3911 = vst [vmem:[#allocation49_spill] sm:$0xff] %v2071_v40  ;;  %v2073_v34 = vld [vmem:[#allocation2 + $0x280] sm:$0xff]  ;;  %v2082_v63 = vld [vmem:[#allocation2 + $0x2a8] sm:$0xff]  ;;  %v277_v62 = vadd.f32 %v276_v58, %v2065_v17  ;;  %v262_v57 = vadd.f32 %v261_v44, %v2052_v46  ;;  %v272_v9 = vsel %vm181_vm0, %v2071_v40, 0.0 }
  0x30   :  { %3912 = vst [vmem:[#allocation50_spill] sm:$0xff] %v2073_v34  ;;  %v2080_v47 = vld [vmem:[#allocation2 + $0x2a0] sm:$0xff]  ;;  %3914 = vst [vmem:[#allocation52_spill] sm:$0xff] %v2082_v63  ;;  %v2084_v55 = vld [vmem:[#allocation2 + $0x2b0] sm:$0xff]  ;;  %v270_v4 = vadd.f32 %v269_v11, %v2069_v32  ;;  %256 = vadd.xlane.f32.xlu0 %v255_v0 }
  0x31   :  { %3913 = vst [vmem:[#allocation51_spill] sm:$0xff] %v2080_v47  ;;  %3915 = vst [vmem:[#allocation53_spill] sm:$0xff] %v2084_v55  ;;  %v2088_v23 = vld [vmem:[#allocation2 + $0x258] sm:$0xff]  ;;  %v2090_v25 = vld [vmem:[#allocation2 + $0x288] sm:$0xff]  ;;  %v285_v29 = vadd.f32 %v2082_v63, %v2080_v47  ;;  %v278_v63 = vadd.f32 %v277_v62, %v2073_v34  ;;  %v264_v47 = vadd.f32 %v263_v54, %v262_v57 }
  0x32   :  { %3916 = vst [vmem:[#allocation54_spill] sm:$0xff] %v2088_v23  ;;  %3917 = vst [vmem:[#allocation55_spill] sm:$0xff] %v2090_v25  ;;  %v2097_v33 = vld [vmem:[#allocation2 + $0x290] sm:$0xff]  ;;  %v2099_v16 = vld [vmem:[#allocation2 + $0x2b8] sm:$0xff]  ;;  %v271_v17 = vadd.f32 %v270_v4, %v2088_v23 }
  0x33   :  { %3918 = vst [vmem:[#allocation56_spill] sm:$0xff] %v2097_v33  ;;  %3919 = vst [vmem:[#allocation57_spill] sm:$0xff] %v2099_v16  ;;  %v2101_v35 = vld [vmem:[#allocation2 + $0x2d8] sm:$0xff]  ;;  %v2103_v52 = vld [vmem:[#allocation2 + $0x2e0] sm:$0xff]  ;;  %v286_v44 = vadd.f32 %v285_v29, %v2084_v55  ;;  %v279_v62 = vadd.f32 %v278_v63, %v2090_v25  ;;  %265 = vadd.xlane.f32.xlu1 %v264_v47 }
  0x34   :  { %3920 = vst [vmem:[#allocation58_spill] sm:$0xff] %v2101_v35  ;;  %3921 = vst [vmem:[#allocation59_spill] sm:$0xff] %v2103_v52  ;;  %v2107_v58 = vld [vmem:[#allocation2 + $0x298] sm:$0xff]  ;;  %v2110_v42 = vld [vmem:[#allocation2 + $0x2c0] sm:$0xff]  ;;  %v294_v59 = vadd.f32 %v2103_v52, %v2101_v35  ;;  %v273_v57 = vadd.f32 %v272_v9, %v271_v17 }
  0x35   :  { %3922 = vst [vmem:[#allocation60_spill] sm:$0xff] %v2107_v58  ;;  %3923 = vst [vmem:[#allocation61_spill] sm:$0xff] %v2110_v42  ;;  %v2113_v11 = vld [vmem:[#allocation2 + $0x2e8] sm:$0xff]  ;;  %v2120_v40 = vld [vmem:[#allocation2 + $0x2f0] sm:$0xff]  ;;  %v287_v29 = vadd.f32 %v286_v44, %v2099_v16  ;;  %v281_v54 = vsel %vm181_vm0, %v2107_v58, 0.0 }
  0x36   :  { %3924 = vst [vmem:[#allocation62_spill] sm:$0xff] %v2113_v11  ;;  %v2118_v32 = vld [vmem:[#allocation2 + $0x2c8] sm:$0xff]  ;;  %3926 = vst [vmem:[#allocation64_spill] sm:$0xff] %v2120_v40  ;;  %v2122_v46 = vld [vmem:[#allocation2 + $0x310] sm:$0xff]  ;;  %v295_v55 = vadd.f32 %v294_v59, %v2113_v11  ;;  %v280_v59 = vadd.f32 %v279_v62, %v2097_v33  ;;  %274 = vadd.xlane.f32.xlu0 %v273_v57 }
  0x37   :  { %3925 = vst [vmem:[#allocation63_spill] sm:$0xff] %v2118_v32  ;;  %3927 = vst [vmem:[#allocation65_spill] sm:$0xff] %v2122_v46  ;;  %v2125_v34 = vld [vmem:[#allocation2 + $0x2d0] sm:$0xff]  ;;  %v2129_v48 = vld [vmem:[#allocation2 + $0x318] sm:$0xff]  ;;  %v288_v11 = vadd.f32 %v287_v29, %v2110_v42 }
  0x38   :  { %3928 = vst [vmem:[#allocation66_spill] sm:$0xff] %v2125_v34  ;;  %3929 = vst [vmem:[#allocation67_spill] sm:$0xff] %v2129_v48  ;;  %v2131_v0 = vld [vmem:[#allocation2 + $0x320] sm:$0xff]  ;;  %v2135_v4 = vld [vmem:[#allocation2 + $0x2f8] sm:$0xff]  ;;  %v303_v44 = vadd.f32 %v2129_v48, %v2122_v46  ;;  %v296_v35 = vadd.f32 %v295_v55, %v2120_v40  ;;  %v290_v16 = vsel %vm181_vm0, %v2125_v34, 0.0  ;;  %v282_v55 = vadd.f32 %v281_v54, %v280_v59 }
  0x39   :  { %3930 = vst [vmem:[#allocation68_spill] sm:$0xff] %v2131_v0  ;;  %3931 = vst [vmem:[#allocation69_spill] sm:$0xff] %v2135_v4  ;;  %v2137_v52 = vld [vmem:[#allocation2 + $0x308] sm:$0xff]  ;;  %v2148_v9 = vld [vmem:[#allocation2 + $0x350] sm:$0xff]  ;;  %v289_v48 = vadd.f32 %v288_v11, %v2118_v32 }
  0x3a   :  { %3932 = vst [vmem:[#allocation70_spill] sm:$0xff] %v2137_v52  ;;  %v2139_v63 = vld [vmem:[#allocation2 + $0x328] sm:$0xff]  ;;  %3935 = vst [vmem:[#allocation73_spill] sm:$0xff] %v2148_v9  ;;  %v2150_v17 = vld [vmem:[#allocation2 + $0x358] sm:$0xff]  ;;  %v304_v62 = vadd.f32 %v303_v44, %v2131_v0  ;;  %v297_v46 = vadd.f32 %v296_v35, %v2135_v4  ;;  %v299_v33 = vsel %vm181_vm0, %v2137_v52, 0.0  ;;  %283 = vadd.xlane.f32.xlu1 %v282_v55 }
  0x3b   :  { %3933 = vst [vmem:[#allocation71_spill] sm:$0xff] %v2139_v63  ;;  %v2146_v47 = vld [vmem:[#allocation2 + $0x348] sm:$0xff]  ;;  %3936 = vst [vmem:[#allocation74_spill] sm:$0xff] %v2150_v17  ;;  %v2154_v58 = vld [vmem:[#allocation2 + $0x300] sm:$0xff] }
  0x3c   :  { %3934 = vst [vmem:[#allocation72_spill] sm:$0xff] %v2146_v47  ;;  %3937 = vst [vmem:[#allocation75_spill] sm:$0xff] %v2154_v58  ;;  %v2156_v25 = vld [vmem:[#allocation2 + $0x330] sm:$0xff]  ;;  %v312_v29 = vadd.f32 %v2148_v9, %v2146_v47  ;;  %v2163_v40 = vld [vmem:[#allocation2 + $0x338] sm:$0xff]  ;;  %v305_v9 = vadd.f32 %v304_v62, %v2139_v63  ;;  %v291_v47 = vadd.f32 %v290_v16, %v289_v48 }
  0x3d   :  { %3938 = vst [vmem:[#allocation76_spill] sm:$0xff] %v2156_v25  ;;  %3939 = vst [vmem:[#allocation77_spill] sm:$0xff] %v2163_v40  ;;  %v2165_v57 = vld [vmem:[#allocation2 + $0x360] sm:$0xff]  ;;  %v2169_v34 = vld [vmem:[#allocation2 + $0x388] sm:$0xff]  ;;  %v298_v0 = vadd.f32 %v297_v46, %v2154_v58 }
  0x3e   :  { %3940 = vst [vmem:[#allocation78_spill] sm:$0xff] %v2165_v57  ;;  %v2167_v42 = vld [vmem:[#allocation2 + $0x380] sm:$0xff]  ;;  %3942 = vst [vmem:[#allocation80_spill] sm:$0xff] %v2169_v34  ;;  %v2176_v54 = vld [vmem:[#allocation2 + $0x368] sm:$0xff]  ;;  %v313_v11 = vadd.f32 %v312_v29, %v2150_v17  ;;  %v306_v62 = vadd.f32 %v305_v9, %v2156_v25  ;;  %292 = vadd.xlane.f32.xlu0 %v291_v47 }
  0x3f   :  { %3941 = vst [vmem:[#allocation79_spill] sm:$0xff] %v2167_v42  ;;  %v2173_v44 = vld [vmem:[#allocation2 + $0x340] sm:$0xff]  ;;  %3944 = vst [vmem:[#allocation82_spill] sm:$0xff] %v2176_v54  ;;  %v2179_v35 = vld [vmem:[#allocation2 + $0x390] sm:$0xff]  ;;  %v321_v59 = vadd.f32 %v2169_v34, %v2167_v42  ;;  %v300_v46 = vadd.f32 %v299_v33, %v298_v0 }
  0x40   :  { %3943 = vst [vmem:[#allocation81_spill] sm:$0xff] %v2173_v44  ;;  %3945 = vst [vmem:[#allocation83_spill] sm:$0xff] %v2179_v35  ;;  %v2184_v4 = vld [vmem:[#allocation2 + $0x370] sm:$0xff]  ;;  %v2186_v52 = vld [vmem:[#allocation2 + $0x398] sm:$0xff]  ;;  %v314_v29 = vadd.f32 %v313_v11, %v2165_v57  ;;  %v308_v48 = vsel %vm181_vm0, %v2173_v44, 0.0 }
  0x41   :  { %3946 = vst [vmem:[#allocation84_spill] sm:$0xff] %v2184_v4  ;;  %3947 = vst [vmem:[#allocation85_spill] sm:$0xff] %v2186_v52  ;;  %v2188_v32 = vld [vmem:[#allocation2 + $0x3b8] sm:$0xff]  ;;  %v322_v17 = vadd.f32 %v321_v59, %v2179_v35  ;;  %v2195_v23 = vld [vmem:[#allocation2 + $0x3c0] sm:$0xff]  ;;  %v307_v59 = vadd.f32 %v306_v62, %v2163_v40  ;;  %301 = vadd.xlane.f32.xlu1 %v300_v46 }
  0x42   :  { %3948 = vst [vmem:[#allocation86_spill] sm:$0xff] %v2188_v32  ;;  %v2191_v63 = vld [vmem:[#allocation2 + $0x378] sm:$0xff]  ;;  %3950 = vst [vmem:[#allocation88_spill] sm:$0xff] %v2195_v23  ;;  %v2197_v55 = vld [vmem:[#allocation2 + $0x3c8] sm:$0xff]  ;;  %v330_v11 = vadd.f32 %v2195_v23, %v2188_v32  ;;  %v315_v35 = vadd.f32 %v314_v29, %v2176_v54 }
  0x43   :  { %3949 = vst [vmem:[#allocation87_spill] sm:$0xff] %v2191_v63  ;;  %3951 = vst [vmem:[#allocation89_spill] sm:$0xff] %v2197_v55  ;;  %v2201_v16 = vld [vmem:[#allocation2 + $0x3a0] sm:$0xff]  ;;  %v2203_v34 = vld [vmem:[#allocation2 + $0x3b0] sm:$0xff]  ;;  %v323_v42 = vadd.f32 %v322_v17, %v2186_v52  ;;  %v317_v57 = vsel %vm181_vm0, %v2191_v63, 0.0  ;;  %v309_v17 = vadd.f32 %v308_v48, %v307_v59 }
  0x44   :  { %3952 = vst [vmem:[#allocation90_spill] sm:$0xff] %v2201_v16  ;;  %3953 = vst [vmem:[#allocation91_spill] sm:$0xff] %v2203_v34  ;;  %v2205_v9 = vld [vmem:[#allocation2 + $0x3d0] sm:$0xff]  ;;  %v2214_v33 = vld [vmem:[#allocation2 + $0x3f8] sm:$0xff]  ;;  %v331_v62 = vadd.f32 %v330_v11, %v2197_v55  ;;  %v316_v23 = vadd.f32 %v315_v35, %v2184_v4  ;;  %v326_v63 = vsel %vm181_vm0, %v2203_v34, 0.0 }
  0x45   :  { %3954 = vst [vmem:[#allocation92_spill] sm:$0xff] %v2205_v9  ;;  %v2212_v47 = vld [vmem:[#allocation2 + $0x3f0] sm:$0xff]  ;;  %3956 = vst [vmem:[#allocation94_spill] sm:$0xff] %v2214_v33  ;;  %v2216_v0 = vld [vmem:[#allocation2 + $0x400] sm:$0xff]  ;;  %v324_v32 = vadd.f32 %v323_v42, %v2201_v16  ;;  %310 = vadd.xlane.f32.xlu0 %v309_v17 }
  0x46   :  { %3955 = vst [vmem:[#allocation93_spill] sm:$0xff] %v2212_v47  ;;  %3957 = vst [vmem:[#allocation95_spill] sm:$0xff] %v2216_v0  ;;  %v2220_v44 = vld [vmem:[#allocation2 + $0x3a8] sm:$0xff]  ;;  %v2222_v25 = vld [vmem:[#allocation2 + $0x3d8] sm:$0xff]  ;;  %v339_v29 = vadd.f32 %v2214_v33, %v2212_v47  ;;  %v332_v33 = vadd.f32 %v331_v62, %v2205_v9  ;;  %v318_v59 = vadd.f32 %v317_v57, %v316_v23 }
  0x47   :  { %3958 = vst [vmem:[#allocation96_spill] sm:$0xff] %v2222_v25  ;;  %v2229_v52 = vld [vmem:[#allocation2 + $0x408] sm:$0xff]  ;;  %v2233_v54 = vld [vmem:[#allocation2 + $0x430] sm:$0xff]  ;;  %v2237_v40 = vld [vmem:[#allocation2 + $0x3e0] sm:$0xff]  ;;  %v325_v47 = vadd.f32 %v324_v32, %v2220_v44 }
  0x48   :  { %3959 = vst [vmem:[#allocation97_spill] sm:$0xff] %v2229_v52  ;;  %v2231_v46 = vld [vmem:[#allocation2 + $0x428] sm:$0xff]  ;;  %3961 = vst [vmem:[#allocation99_spill] sm:$0xff] %v2233_v54  ;;  %v340_v48 = vadd.f32 %v339_v29, %v2216_v0  ;;  %v2243_v35 = vld [vmem:[#allocation2 + $0x438] sm:$0xff]  ;;  %v333_v4 = vadd.f32 %v332_v33, %v2222_v25  ;;  %319 = vadd.xlane.f32.xlu1 %v318_v59 }
  0x49   :  { %3960 = vst [vmem:[#allocation98_spill] sm:$0xff] %v2231_v46  ;;  %3962 = vst [vmem:[#allocation100_spill] sm:$0xff] %v2237_v40  ;;  %v2239_v11 = vld [vmem:[#allocation2 + $0x3e8] sm:$0xff]  ;;  %v348_v42 = vadd.f32 %v2233_v54, %v2231_v46  ;;  %v2248_v55 = vld [vmem:[#allocation2 + $0x410] sm:$0xff]  ;;  %v327_v17 = vadd.f32 %v326_v63, %v325_v47 }
  0x4a   :  { %3963 = vst [vmem:[#allocation101_spill] sm:$0xff] %v2243_v35  ;;  %3964 = vst [vmem:[#allocation102_spill] sm:$0xff] %v2248_v55  ;;  %v2250_v34 = vld [vmem:[#allocation2 + $0x440] sm:$0xff]  ;;  %v341_v62 = vadd.f32 %v340_v48, %v2229_v52  ;;  %v170_v0 = vld [vmem:[#allocation2 + $0x468] sm:$0xff]  ;;  %v335_v23 = vsel %vm181_vm0, %v2239_v11, 0.0  ;;  %v334_v33 = vadd.f32 %v333_v4, %v2237_v40 }
  0x4b   :  { %3965 = vst [vmem:[#allocation103_spill] sm:$0xff] %v2250_v34  ;;  %v169_v16 = vld [vmem:[#allocation2 + $0x460] sm:$0xff]  ;;  %v349_v29 = vadd.f32 %v348_v42, %v2243_v35  ;;  %v171_v9 = vld [vmem:[#allocation2 + $0x470] sm:$0xff]  ;;  %v2259_v32 = vld [vmem:[#allocation2 + $0x418] sm:$0xff]  ;;  %328 = vadd.xlane.f32.xlu0 %v327_v17 }
  0x4c   :  { %v2253_v58 = vld [vmem:[#allocation2 + $0x420] sm:$0xff]  ;;  %v2261_v57 = vld [vmem:[#allocation2 + $0x448] sm:$0xff]  ;;  %v357_v54 = vadd.f32 %v170_v0, %v169_v16  ;;  %v342_v46 = vadd.f32 %v341_v62, %v2248_v55  ;;  %v2265_v25 = vld [vmem:[#allocation2 + $0x458] sm:$0xff]  ;;  %v336_v35 = vadd.f32 %v335_v23, %v334_v33 }
  0x4d   :  { %3966 = vst [vmem:[#allocation104_spill] sm:$0xff] %v2253_v58  ;;  %v350_v48 = vadd.f32 %v349_v29, %v2250_v34  ;;  %v172_v42 = vld [vmem:[#allocation2 + $0x478] sm:$0xff]  ;;  %v344_v63 = vsel %vm181_vm0, %v2253_v58, 0.0  ;;  %v2270_v47 = vld [vmem:[#allocation2 + $0x450] sm:$0xff]  ;;  %v173_v4 = vld [vmem:[#allocation2 + $0x480] sm:$0xff]  ;;  %v353_v0 = vsel %vm181_vm0, %v2265_v25, 0.0 }
  0x4e   :  { %v358_v59 = vadd.f32 %v357_v54, %v171_v9  ;;  %v343_v52 = vadd.f32 %v342_v46, %v2259_v32  ;;  %v175_v62 = vld [vmem:[#allocation2 + $0x490] sm:$0xff]  ;;  %337 = vadd.xlane.f32.xlu1 %v336_v35  ;;  %v174_v34 = vld [vmem:[#allocation2 + $0x488] sm:$0xff] }
  0x4f   :  { %v351_v16 = vadd.f32 %v350_v48, %v2261_v57  ;;  %v362_v54 = vsel %vm181_vm0, %v175_v62, 0.0  ;;  %v1270_v23 = vld [vmem:[%s3662_s2 + $0x8] sm:$0xff] }
  0x50   :  { %v359_v55 = vadd.f32 %v358_v59, %v172_v42  ;;  %v345_v29 = vadd.f32 %v344_v63, %v343_v52  ;;  %v1269_v52 = vld [vmem:[%s3662_s2] sm:$0xff] }
  0x51   :  { %v352_v17 = vadd.f32 %v351_v16, %v2270_v47 }
  0x52   :  { %v360_v58 = vadd.f32 %v359_v55, %v173_v4  ;;  %346 = vadd.xlane.f32.xlu0 %v345_v29 }
  0x53   :  { %v354_v40 = vadd.f32 %v353_v0, %v352_v17 }
  0x54   :  { %v361_v9 = vadd.f32 %v360_v58, %v174_v34 }
  0x55   :  { %355 = vadd.xlane.f32.xlu1 %v354_v40 }
  0x56   :  { %v363_v46 = vadd.f32 %v362_v54, %v361_v9 }
  0x58   :  { %364 = vadd.xlane.f32.xlu0 %v363_v46 }
  0x66   :  { %1297 = vperm.xlu1 %1712, %v1270_v23  }
  0x6e   :  { %1292 = vperm.xlu0 %1711, %v1269_v52  }
  0xa4   :  { %v203_v35 = vpop.xlane.xlu1 %202 }
  0xa5   :  { %v389_v55 = vmul.f32 0.0012755102, %v203_v35 }
  0xa6   :  { %v185_v33 = vpop.xlane.xlu0 %184 }
  0xa7   :  { %v387_v48 = vmul.f32 0.0012755102, %v185_v33  ;;  %v2285_v42 = vsub.f32 %v1837_v1, %v389_v55  ;;  %v2288_v40 = vsub.f32 %v1839_v2, %v389_v55  ;;  %v2300_v59 = vsub.f32 %v1841_v3, %v389_v55 }
  0xa8   :  { %v2309_v2 = vsub.f32 %v1845_v5, %v389_v55  ;;  %v2330_v62 = vsub.f32 %v1858_v12, %v389_v55 }
  0xa9   :  { %v2291_v34 = vsub.f32 %v1847_v6, %v387_v48  ;;  %v2294_v58 = vsub.f32 %v1849_v7, %v387_v48  ;;  %v2297_v63 = vsub.f32 %v1854_v10, %v387_v48  ;;  %3967 = vst [vmem:[#allocation105_spill] sm:$0xff] %v2300_v59  ;;  %v2303_v4 = vsub.f32 %v1860_v13, %v387_v48 }
  0xaa   :  { %v194_v16 = vpop.xlane.xlu0 %193  ;;  %v2306_v1 = vsub.f32 %v1874_v21, %v387_v48  ;;  %3968 = vst [vmem:[#allocation106_spill] sm:$0xff] %v2309_v2  ;;  %v2312_v6 = vsub.f32 %v1864_v15, %v389_v55  ;;  %v212_v7 = vpop.xlane.xlu1 %211  ;;  %v2315_v10 = vsub.f32 %v1872_v20, %v387_v48  ;;  %v569_v21 = vmul.f32 %v2285_v42, %v2285_v42 }
  0xab   :  { %v555_v3 = vmul.f32 %v2291_v34, %v2291_v34  ;;  %v556_v13 = vmul.f32 %v2294_v58, %v2294_v58  ;;  %v388_v0 = vmul.f32 0.0012755102, %v194_v16  ;;  %v2324_v5 = vsub.f32 %v1890_v30, %v387_v48 }
  0xac   :  { %3969 = vst [vmem:[#allocation107_spill] sm:$0xff] %v2312_v6  ;;  %v2327_v15 = vsub.f32 %v1851_v8, %v389_v55  ;;  %v557_v20 = vmul.f32 %v2297_v63, %v2297_v63  ;;  %v570_v17 = vmul.f32 %v2288_v40, %v2288_v40  ;;  %v571_v54 = vmul.f32 %v2300_v59, %v2300_v59 }
  0xad   :  { %v702_v29 = vadd.f32 %v556_v13, %v555_v3  ;;  %v390_v9 = vmul.f32 0.0012755102, %v212_v7  ;;  %v558_v30 = vmul.f32 %v2303_v4, %v2303_v4  ;;  %v561_v8 = vmul.f32 %v2306_v1, %v2306_v1 }
  0xae   :  { %3970 = vst [vmem:[#allocation108_spill] sm:$0xff] %v2327_v15  ;;  %v221_v46 = vpop.xlane.xlu0 %220  ;;  %v575_v12 = vmul.f32 %v2312_v6, %v2312_v6  ;;  %v559_v23 = vmul.f32 %v2315_v10, %v2315_v10  ;;  %v572_v35 = vmul.f32 %v2309_v2, %v2309_v2  ;;  %v720_v55 = vadd.f32 %v570_v17, %v569_v21 }
  0xaf   :  { %v703_v52 = vadd.f32 %v702_v29, %v557_v20  ;;  %v230_v33 = vpop.xlane.xlu1 %229  ;;  %v560_v48 = vmul.f32 %v2324_v5, %v2324_v5  ;;  %v573_v16 = vmul.f32 %v2327_v15, %v2327_v15  ;;  %v2353_v7 = vsub.f32 %v1862_v14, %v388_v0 }
  0xb0   :  { %v2356_v3 = vsub.f32 %v1868_v18, %v388_v0  ;;  %v574_v20 = vmul.f32 %v2330_v62, %v2330_v62  ;;  %v721_v29 = vadd.f32 %v720_v55, %v571_v54  ;;  %v2361_v21 = vsub.f32 %v1870_v19, %v388_v0 }
  0xb1   :  { %v704_v13 = vadd.f32 %v703_v52, %v558_v30  ;;  %v2363_v17 = vmul.f32 0.0012755102, %v221_v46  ;;  %v707_v2 = vsel %vm181_vm0, %v561_v8, 0.0  ;;  %v725_v15 = vsel %vm181_vm0, %v575_v12, 0.0 }
  0xb2   :  { %v239_v6 = vpop.xlane.xlu0 %238  ;;  %v562_v14 = vmul.f32 %v2353_v7, %v2353_v7  ;;  %v722_v59 = vadd.f32 %v721_v29, %v572_v35  ;;  %v2370_v30 = vsub.f32 %v1909_v41, %v388_v0  ;;  %v563_v54 = vmul.f32 %v2356_v3, %v2356_v3 }
  0xb3   :  { %v705_v18 = vadd.f32 %v704_v13, %v559_v23  ;;  %v2374_v19 = vmul.f32 0.0012755102, %v230_v33  ;;  %v2377_v52 = vsub.f32 %v1876_v22, %v388_v0  ;;  %v2380_v8 = vsub.f32 %v1892_v31, %v388_v0 }
  0xb4   :  { %v2383_v12 = vsub.f32 %v1899_v36, %v388_v0  ;;  %v2385_v23 = vmul.f32 0.0012755102, %v239_v6  ;;  %v723_v41 = vadd.f32 %v722_v59, %v573_v16  ;;  %v564_v55 = vmul.f32 %v2361_v21, %v2361_v21 }
  0xb5   :  { %v248_v46 = vpop.xlane.xlu1 %247  ;;  %v706_v35 = vadd.f32 %v705_v18, %v560_v48  ;;  %v711_v13 = vadd.f32 %v563_v54, %v562_v14  ;;  %v2390_v33 = vsub.f32 %v1882_v26, %v390_v9  ;;  %v2393_v22 = vsub.f32 %v1884_v27, %v390_v9 }
  0xb6   :  { %v2396_v31 = vsub.f32 %v1886_v28, %v390_v9  ;;  %v724_v0 = vadd.f32 %v723_v41, %v574_v20  ;;  %v568_v6 = vmul.f32 %v2370_v30, %v2370_v30  ;;  %v2401_v59 = vsub.f32 %v1901_v37, %v390_v9 }
  0xb7   :  { %3971 = vst [vmem:[#allocation109_spill] sm:$0xff] %v2390_v33  ;;  %v708_v36 = vadd.f32 %v707_v2, %v706_v35  ;;  %v565_v48 = vmul.f32 %v2377_v52, %v2377_v52  ;;  %v566_v26 = vmul.f32 %v2380_v8, %v2380_v8  ;;  %v567_v27 = vmul.f32 %v2383_v12, %v2383_v12 }
  0xb8   :  { %v712_v28 = vadd.f32 %v711_v13, %v564_v55  ;;  %v2410_v2 = vsub.f32 %v1912_v43, %v390_v9  ;;  %v2413_v16 = vsub.f32 %v1927_v53, %v390_v9  ;;  %v576_v37 = vmul.f32 %v2390_v33, %v2390_v33 }
  0xb9   :  { %v257_v29 = vpop.xlane.xlu0 %256  ;;  %709 = vadd.xlane.f32.xlu1 %v708_v36  ;;  %v577_v20 = vmul.f32 %v2393_v22, %v2393_v22  ;;  %v2419_v14 = vmul.f32 0.0012755102, %v248_v46  ;;  %v2422_v35 = vsub.f32 %v1920_v49, %v390_v9  ;;  %v578_v43 = vmul.f32 %v2396_v31, %v2396_v31 }
  0xba   :  { %v713_v54 = vadd.f32 %v712_v28, %v565_v48  ;;  %v726_v41 = vadd.f32 %v725_v15, %v724_v0  ;;  %v716_v53 = vsel %vm181_vm0, %v568_v6, 0.0  ;;  %v579_v55 = vmul.f32 %v2401_v59, %v2401_v59 }
  0xbb   :  { %v729_v13 = vadd.f32 %v577_v20, %v576_v37  ;;  %v582_v46 = vmul.f32 %v2413_v16, %v2413_v16  ;;  %v2433_v48 = vsub.f32 %v1903_v38, %v2363_v17  ;;  %v2437_v49 = vsub.f32 %v1905_v39, %v2363_v17 }
  0xbc   :  { %v266_v18 = vpop.xlane.xlu1 %265  ;;  %v714_v33 = vadd.f32 %v713_v54, %v566_v26  ;;  %v2439_v15 = vmul.f32 0.0012755102, %v257_v29  ;;  %v580_v9 = vmul.f32 %v2410_v2, %v2410_v2  ;;  %v2445_v6 = vsub.f32 %v1915_v45, %v2363_v17 }
  0xbd   :  { %727 = vadd.xlane.f32.xlu1 %v726_v41  ;;  %v730_v0 = vadd.f32 %v729_v13, %v578_v43  ;;  %v2447_v26 = vmul.f32 0.0012755102, %v266_v18  ;;  %v581_v38 = vmul.f32 %v2422_v35, %v2422_v35  ;;  %v2453_v39 = vsub.f32 %v1939_v61, %v2363_v17 }
  0xbe   :  { %v715_v28 = vadd.f32 %v714_v33, %v567_v27  ;;  %v2457_v37 = vsub.f32 %v1922_v50, %v2363_v17  ;;  %v583_v20 = vmul.f32 %v2433_v48, %v2433_v48  ;;  %v584_v45 = vmul.f32 %v2437_v49, %v2437_v49 }
  0xbf   :  { %v275_v36 = vpop.xlane.xlu0 %274  ;;  %3972 = vst [vmem:[#allocation110_spill] sm:$0xff] %v2453_v39  ;;  %v731_v29 = vadd.f32 %v730_v0, %v579_v55  ;;  %v734_v54 = vsel %vm181_vm0, %v582_v46, 0.0  ;;  %v2468_v61 = vsub.f32 %v1937_v60, %v2363_v17  ;;  %v2472_v50 = vsub.f32 %v1956_v24, %v2363_v17  ;;  %v3978_v24 = vld [vmem:[#allocation8_spill] sm:$0xff] }
  0xc0   :  { %3973 = vst [vmem:[#allocation111_spill] sm:$0xff] %v2457_v37  ;;  %v2463_v18 = vmul.f32 0.0012755102, %v275_v36  ;;  %v717_v33 = vadd.f32 %v716_v53, %v715_v28  ;;  %v585_v41 = vmul.f32 %v2445_v6, %v2445_v6  ;;  %v589_v55 = vmul.f32 %v2453_v39, %v2453_v39  ;;  %v3980_v28 = vld [vmem:[#allocation9_spill] sm:$0xff] }
  0xc1   :  { %3974 = vst [vmem:[#allocation112_spill] sm:$0xff] %v2468_v61  ;;  %v732_v43 = vadd.f32 %v731_v29, %v580_v9  ;;  %3975 = vst [vmem:[#allocation113_spill] sm:$0xff] %v2472_v50  ;;  %v738_v13 = vadd.f32 %v584_v45, %v583_v20  ;;  %v2480_v36 = vsub.f32 %v1924_v51, %v2374_v19 }
  0xc2   :  { %718 = vadd.xlane.f32.xlu0 %v717_v33  ;;  %v2484_v60 = vsub.f32 %v1931_v56, %v2374_v19  ;;  %v2488_v17 = vsub.f32 %v3978_v24, %v2374_v19  ;;  %v586_v0 = vmul.f32 %v2457_v37, %v2457_v37  ;;  %v2496_v29 = vsub.f32 %v3980_v28, %v2374_v19  ;;  %v3982_v56 = vld [vmem:[#allocation13_spill] sm:$0xff]  ;;  %v3984_v33 = vld [vmem:[#allocation18_spill] sm:$0xff] }
  0xc3   :  { %v284_v27 = vpop.xlane.xlu1 %283  ;;  %3976 = vst [vmem:[#allocation114_spill] sm:$0xff] %v2480_v36  ;;  %v733_v9 = vadd.f32 %v732_v43, %v581_v38  ;;  %v587_v51 = vmul.f32 %v2468_v61, %v2468_v61  ;;  %v739_v20 = vadd.f32 %v738_v13, %v585_v41  ;;  %v2502_v45 = vsub.f32 %v3982_v56, %v2374_v19 }
  0xc4   :  { %3977 = vst [vmem:[#allocation115_spill] sm:$0xff] %v2484_v60  ;;  %3979 = vst [vmem:[#allocation8_spill] sm:$0xff] %v2488_v17  ;;  %v2490_v46 = vmul.f32 0.0012755102, %v284_v27  ;;  %v2506_v27 = vsub.f32 %v3984_v33, %v2374_v19  ;;  %v590_v43 = vmul.f32 %v2480_v36, %v2480_v36  ;;  %v591_v24 = vmul.f32 %v2484_v60, %v2484_v60 }
  0xc5   :  { %3981 = vst [vmem:[#allocation9_spill] sm:$0xff] %v2496_v29  ;;  %3983 = vst [vmem:[#allocation13_spill] sm:$0xff] %v2502_v45  ;;  %v735_v38 = vadd.f32 %v734_v54, %v733_v9  ;;  %v592_v28 = vmul.f32 %v2488_v17, %v2488_v17  ;;  %v588_v41 = vmul.f32 %v2472_v50, %v2472_v50  ;;  %v743_v56 = vsel %vm181_vm0, %v589_v55, 0.0  ;;  %v3986_v54 = vld [vmem:[#allocation14_spill] sm:$0xff]  ;;  %v3990_v55 = vld [vmem:[#allocation11_spill] sm:$0xff] }
  0xc6   :  { %3985 = vst [vmem:[#allocation18_spill] sm:$0xff] %v2506_v27  ;;  %v740_v13 = vadd.f32 %v739_v20, %v586_v0  ;;  %v2521_v9 = vsub.f32 %v3986_v54, %v2374_v19  ;;  %v593_v60 = vmul.f32 %v2496_v29, %v2496_v29  ;;  %v747_v36 = vadd.f32 %v591_v24, %v590_v43  ;;  %v3988_v17 = vld [vmem:[#allocation10_spill] sm:$0xff]  ;;  %v3992_v19 = vld [vmem:[#allocation12_spill] sm:$0xff] }
  0xc7   :  { %v293_v53 = vpop.xlane.xlu0 %292  ;;  %736 = vadd.xlane.f32.xlu0 %v735_v38  ;;  %v596_v0 = vmul.f32 %v2506_v27, %v2506_v27  ;;  %v2533_v20 = vsub.f32 %v3990_v55, %v2385_v23  ;;  %v2537_v38 = vsub.f32 %v3992_v19, %v2385_v23  ;;  %v594_v43 = vmul.f32 %v2502_v45, %v2502_v45  ;;  %v3996_v27 = vld [vmem:[#allocation19_spill] sm:$0xff] }
  0xc8   :  { %v2514_v39 = vmul.f32 0.0012755102, %v293_v53  ;;  %3987 = vst [vmem:[#allocation14_spill] sm:$0xff] %v2521_v9  ;;  %v2527_v53 = vsub.f32 %v3988_v17, %v2385_v23  ;;  %v741_v61 = vadd.f32 %v740_v13, %v587_v51  ;;  %v748_v17 = vadd.f32 %v747_v36, %v592_v28  ;;  %v3994_v51 = vld [vmem:[#allocation15_spill] sm:$0xff] }
  0xc9   :  { %3991 = vst [vmem:[#allocation11_spill] sm:$0xff] %v2533_v20  ;;  %3993 = vst [vmem:[#allocation12_spill] sm:$0xff] %v2537_v38  ;;  %v2545_v24 = vsub.f32 %v3994_v51, %v2385_v23  ;;  %v2549_v29 = vsub.f32 %v3996_v27, %v2385_v23  ;;  %v595_v36 = vmul.f32 %v2521_v9, %v2521_v9  ;;  %v3998_v51 = vld [vmem:[#allocation21_spill] sm:$0xff]  ;;  %v752_v27 = vsel %vm181_vm0, %v596_v0, 0.0 }
  0xca   :  { %v302_v33 = vpop.xlane.xlu1 %301  ;;  %3989 = vst [vmem:[#allocation10_spill] sm:$0xff] %v2527_v53  ;;  %v742_v13 = vadd.f32 %v741_v61, %v588_v41  ;;  %v597_v55 = vmul.f32 %v2527_v53, %v2527_v53  ;;  %v749_v28 = vadd.f32 %v748_v17, %v593_v60  ;;  %v2561_v45 = vsub.f32 %v3998_v51, %v2385_v23  ;;  %v4002_v60 = vld [vmem:[#allocation16_spill] sm:$0xff]  ;;  %v4008_v51 = vld [vmem:[#allocation22_spill] sm:$0xff] }
  0xcb   :  { %v2539_v54 = vmul.f32 0.0012755102, %v302_v33  ;;  %3995 = vst [vmem:[#allocation15_spill] sm:$0xff] %v2545_v24  ;;  %3997 = vst [vmem:[#allocation19_spill] sm:$0xff] %v2549_v29  ;;  %v598_v33 = vmul.f32 %v2533_v20, %v2533_v20  ;;  %v599_v41 = vmul.f32 %v2537_v38, %v2537_v38  ;;  %v4000_v20 = vld [vmem:[#allocation24_spill] sm:$0xff]  ;;  %v600_v9 = vmul.f32 %v2545_v24, %v2545_v24 }
  0xcc   :  { %3999 = vst [vmem:[#allocation21_spill] sm:$0xff] %v2561_v45  ;;  %v744_v61 = vadd.f32 %v743_v56, %v742_v13  ;;  %v750_v50 = vadd.f32 %v749_v28, %v594_v43  ;;  %v2574_v17 = vsub.f32 %v4002_v60, %v2419_v14  ;;  %v601_v56 = vmul.f32 %v2549_v29, %v2549_v29  ;;  %v4010_v60 = vld [vmem:[#allocation27_spill] sm:$0xff] }
  0xcd   :  { %v756_v53 = vadd.f32 %v598_v33, %v597_v55  ;;  %v4004_v55 = vld [vmem:[#allocation17_spill] sm:$0xff]  ;;  %v602_v28 = vmul.f32 %v2561_v45, %v2561_v45 }
  0xce   :  { %v311_v37 = vpop.xlane.xlu0 %310  ;;  %4003 = vst [vmem:[#allocation16_spill] sm:$0xff] %v2574_v17  ;;  %745 = vadd.xlane.f32.xlu1 %v744_v61  ;;  %v2580_v43 = vsub.f32 %v4004_v55, %v2419_v14  ;;  %v751_v33 = vadd.f32 %v750_v50, %v595_v36  ;;  %v2590_v61 = vsub.f32 %v4008_v51, %v2419_v14  ;;  %v4012_v55 = vld [vmem:[#allocation28_spill] sm:$0xff] }
  0xcf   :  { %v2555_v19 = vmul.f32 0.0012755102, %v311_v37  ;;  %v2568_v37 = vsub.f32 %v4000_v20, %v2385_v23  ;;  %v757_v0 = vadd.f32 %v756_v53, %v599_v41  ;;  %v4006_v23 = vld [vmem:[#allocation20_spill] sm:$0xff]  ;;  %v2594_v53 = vsub.f32 %v4010_v60, %v2419_v14 }
  0xd0   :  { %4005 = vst [vmem:[#allocation17_spill] sm:$0xff] %v2580_v43  ;;  %v2584_v20 = vsub.f32 %v4006_v23, %v2419_v14  ;;  %4009 = vst [vmem:[#allocation22_spill] sm:$0xff] %v2590_v61  ;;  %v2598_v29 = vsub.f32 %v4012_v55, %v2419_v14  ;;  %v604_v23 = vmul.f32 %v2574_v17, %v2574_v17 }
  0xd1   :  { %4001 = vst [vmem:[#allocation24_spill] sm:$0xff] %v2568_v37  ;;  %v320_v13 = vpop.xlane.xlu1 %319  ;;  %4011 = vst [vmem:[#allocation27_spill] sm:$0xff] %v2594_v53  ;;  %v758_v41 = vadd.f32 %v757_v0, %v600_v9  ;;  %v605_v50 = vmul.f32 %v2580_v43, %v2580_v43  ;;  %v753_v36 = vadd.f32 %v752_v27, %v751_v33  ;;  %v4014_v0 = vld [vmem:[#allocation33_spill] sm:$0xff]  ;;  %v4016_v33 = vld [vmem:[#allocation23_spill] sm:$0xff] }
  0xd2   :  { %4007 = vst [vmem:[#allocation20_spill] sm:$0xff] %v2584_v20  ;;  %4013 = vst [vmem:[#allocation28_spill] sm:$0xff] %v2598_v29  ;;  %v603_v51 = vmul.f32 %v2568_v37, %v2568_v37  ;;  %v2606_v45 = vmul.f32 0.0012755102, %v320_v13  ;;  %v606_v60 = vmul.f32 %v2584_v20, %v2584_v20  ;;  %v2612_v55 = vsub.f32 %v4014_v0, %v2419_v14  ;;  %v4018_v43 = vld [vmem:[#allocation25_spill] sm:$0xff] }
  0xd3   :  { %v759_v9 = vadd.f32 %v758_v41, %v601_v56  ;;  %v607_v17 = vmul.f32 %v2590_v61, %v2590_v61  ;;  %v765_v24 = vadd.f32 %v605_v50, %v604_v23  ;;  %754 = vadd.xlane.f32.xlu0 %v753_v36  ;;  %v610_v27 = vmul.f32 %v2598_v29, %v2598_v29  ;;  %v4020_v56 = vld [vmem:[#allocation26_spill] sm:$0xff]  ;;  %v4022_v36 = vld [vmem:[#allocation29_spill] sm:$0xff] }
  0xd4   :  { %4015 = vst [vmem:[#allocation33_spill] sm:$0xff] %v2612_v55  ;;  %v2620_v13 = vsub.f32 %v4016_v33, %v2439_v15  ;;  %v2624_v20 = vsub.f32 %v4018_v43, %v2439_v15  ;;  %v2628_v14 = vsub.f32 %v4020_v56, %v2439_v15  ;;  %v329_v0 = vpop.xlane.xlu0 %328  ;;  %v608_v23 = vmul.f32 %v2594_v53, %v2594_v53  ;;  %v4024_v61 = vld [vmem:[#allocation34_spill] sm:$0xff] }
  0xd5   :  { %v760_v41 = vadd.f32 %v759_v9, %v602_v28  ;;  %v766_v50 = vadd.f32 %v765_v24, %v606_v60  ;;  %v2634_v29 = vsub.f32 %v4022_v36, %v2439_v15  ;;  %v761_v33 = vsel %vm181_vm0, %v603_v51, 0.0  ;;  %v4026_v36 = vld [vmem:[#allocation35_spill] sm:$0xff] }
  0xd6   :  { %4017 = vst [vmem:[#allocation23_spill] sm:$0xff] %v2620_v13  ;;  %4019 = vst [vmem:[#allocation25_spill] sm:$0xff] %v2624_v20  ;;  %v2639_v43 = vsub.f32 %v4024_v61, %v2439_v15  ;;  %v611_v56 = vmul.f32 %v2620_v13, %v2620_v13  ;;  %v612_v28 = vmul.f32 %v2624_v20, %v2624_v20  ;;  %v2651_v51 = vmul.f32 0.0012755102, %v329_v0 }
  0xd7   :  { %4021 = vst [vmem:[#allocation26_spill] sm:$0xff] %v2628_v14  ;;  %4023 = vst [vmem:[#allocation29_spill] sm:$0xff] %v2634_v29  ;;  %v762_v9 = vadd.f32 %v761_v33, %v760_v41  ;;  %v609_v24 = vmul.f32 %v2612_v55, %v2612_v55  ;;  %v767_v60 = vadd.f32 %v766_v50, %v607_v17  ;;  %v770_v61 = vsel %vm181_vm0, %v610_v27, 0.0  ;;  %v4028_v41 = vld [vmem:[#allocation39_spill] sm:$0xff]  ;;  %v4030_v50 = vld [vmem:[#allocation30_spill] sm:$0xff] }
  0xd8   :  { %4025 = vst [vmem:[#allocation34_spill] sm:$0xff] %v2639_v43  ;;  %v2649_v53 = vsub.f32 %v4026_v36, %v2439_v15  ;;  %v613_v37 = vmul.f32 %v2628_v14, %v2628_v14  ;;  %v774_v13 = vadd.f32 %v612_v28, %v611_v56  ;;  %v2658_v33 = vsub.f32 %v4028_v41, %v2439_v15  ;;  %v4031_v14 = vld [vmem:[#allocation31_spill] sm:$0xff] }
  0xd9   :  { %763 = vadd.xlane.f32.xlu1 %v762_v9  ;;  %v768_v38 = vadd.f32 %v767_v60, %v608_v23  ;;  %v614_v17 = vmul.f32 %v2634_v29, %v2634_v29  ;;  %v2664_v36 = vsub.f32 %v4030_v50, %v2447_v26  ;;  %v615_v27 = vmul.f32 %v2639_v43, %v2639_v43  ;;  %v4032_v23 = vld [vmem:[#allocation32_spill] sm:$0xff] }
  0xda   :  { %4027 = vst [vmem:[#allocation35_spill] sm:$0xff] %v2649_v53  ;;  %4029 = vst [vmem:[#allocation39_spill] sm:$0xff] %v2658_v33  ;;  %v775_v0 = vadd.f32 %v774_v13, %v613_v37  ;;  %v2670_v56 = vsub.f32 %v4031_v14, %v2447_v26  ;;  %v2674_v28 = vsub.f32 %v4032_v23, %v2447_v26  ;;  %v4034_v60 = vld [vmem:[#allocation36_spill] sm:$0xff]  ;;  %v4038_v13 = vld [vmem:[#allocation45_spill] sm:$0xff] }
  0xdb   :  { %v769_v15 = vadd.f32 %v768_v38, %v609_v24  ;;  %v616_v9 = vmul.f32 %v2649_v53, %v2649_v53  ;;  %v2680_v41 = vsub.f32 %v4034_v60, %v2447_v26  ;;  %v4036_v50 = vld [vmem:[#allocation40_spill] sm:$0xff]  ;;  %v2688_v14 = vsub.f32 %v4038_v13, %v2447_v26  ;;  %v4040_v53 = vld [vmem:[#allocation42_spill] sm:$0xff] }
  0xdc   :  { %4033 = vst [vmem:[#allocation30_spill] sm:$0xff] %v2674_v28  ;;  %v2684_v43 = vsub.f32 %v4036_v50, %v2447_v26  ;;  %v776_v37 = vadd.f32 %v775_v0, %v614_v17  ;;  %v618_v23 = vmul.f32 %v2664_v36, %v2664_v36  ;;  %v619_v38 = vmul.f32 %v2670_v56, %v2670_v56 }
  0xdd   :  { %4035 = vst [vmem:[#allocation31_spill] sm:$0xff] %v2680_v41  ;;  %4039 = vst [vmem:[#allocation36_spill] sm:$0xff] %v2688_v14  ;;  %v771_v24 = vadd.f32 %v770_v61, %v769_v15  ;;  %v617_v60 = vmul.f32 %v2658_v33, %v2658_v33  ;;  %v2698_v29 = vsub.f32 %v4040_v53, %v2447_v26  ;;  %v4042_v61 = vld [vmem:[#allocation37_spill] sm:$0xff]  ;;  %v4044_v33 = vld [vmem:[#allocation38_spill] sm:$0xff] }
  0xde   :  { %4037 = vst [vmem:[#allocation32_spill] sm:$0xff] %v2684_v43  ;;  %v620_v17 = vmul.f32 %v2674_v28, %v2674_v28  ;;  %v777_v0 = vadd.f32 %v776_v37, %v615_v27  ;;  %v621_v50 = vmul.f32 %v2680_v41, %v2680_v41  ;;  %v624_v13 = vmul.f32 %v2688_v14, %v2688_v14  ;;  %v4046_v53 = vld [vmem:[#allocation41_spill] sm:$0xff]  ;;  %v4048_v27 = vld [vmem:[#allocation43_spill] sm:$0xff] }
  0xdf   :  { %4041 = vst [vmem:[#allocation40_spill] sm:$0xff] %v2698_v29  ;;  %v783_v20 = vadd.f32 %v619_v38, %v618_v23  ;;  %772 = vadd.xlane.f32.xlu0 %v771_v24  ;;  %v2708_v15 = vsub.f32 %v4042_v61, %v2463_v18  ;;  %v2712_v26 = vsub.f32 %v4044_v33, %v2463_v18  ;;  %v4050_v24 = vld [vmem:[#allocation48_spill] sm:$0xff]  ;;  %v779_v33 = vsel %vm181_vm0, %v617_v60, 0.0  ;;  %v4052_v14 = vld [vmem:[#allocation49_spill] sm:$0xff] }
  0xe0   :  { %v2716_v55 = vsub.f32 %v4046_v53, %v2463_v18  ;;  %v2720_v37 = vsub.f32 %v4048_v27, %v2463_v18  ;;  %v778_v41 = vadd.f32 %v777_v0, %v616_v9  ;;  %v622_v23 = vmul.f32 %v2684_v43, %v2684_v43 }
  0xe1   :  { %4043 = vst [vmem:[#allocation45_spill] sm:$0xff] %v2708_v15  ;;  %4045 = vst [vmem:[#allocation42_spill] sm:$0xff] %v2712_v26  ;;  %v784_v38 = vadd.f32 %v783_v20, %v620_v17  ;;  %v2726_v61 = vsub.f32 %v4050_v24, %v2463_v18  ;;  %v2731_v28 = vsub.f32 %v4052_v14, %v2463_v18  ;;  %v788_v27 = vsel %vm181_vm0, %v624_v13, 0.0  ;;  %v4054_v24 = vld [vmem:[#allocation54_spill] sm:$0xff] }
  0xe2   :  { %4047 = vst [vmem:[#allocation37_spill] sm:$0xff] %v2716_v55  ;;  %4049 = vst [vmem:[#allocation38_spill] sm:$0xff] %v2720_v37  ;;  %v625_v53 = vmul.f32 %v2708_v15, %v2708_v15  ;;  %v626_v9 = vmul.f32 %v2712_v26, %v2712_v26  ;;  %v780_v0 = vadd.f32 %v779_v33, %v778_v41  ;;  %v4058_v13 = vld [vmem:[#allocation46_spill] sm:$0xff]  ;;  %v338_v33 = vpop.xlane.xlu1 %337 }
  0xe3   :  { %4051 = vst [vmem:[#allocation41_spill] sm:$0xff] %v2726_v61  ;;  %4053 = vst [vmem:[#allocation43_spill] sm:$0xff] %v2731_v28  ;;  %v623_v20 = vmul.f32 %v2698_v29, %v2698_v29  ;;  %v785_v17 = vadd.f32 %v784_v38, %v621_v50  ;;  %v2742_v60 = vsub.f32 %v4054_v24, %v2463_v18  ;;  %v4056_v50 = vld [vmem:[#allocation44_spill] sm:$0xff] }
  0xe4   :  { %v627_v14 = vmul.f32 %v2716_v55, %v2716_v55  ;;  %v628_v15 = vmul.f32 %v2720_v37, %v2720_v37  ;;  %v792_v43 = vadd.f32 %v626_v9, %v625_v53  ;;  %781 = vadd.xlane.f32.xlu1 %v780_v0  ;;  %v629_v41 = vmul.f32 %v2726_v61, %v2726_v61  ;;  %v4060_v53 = vld [vmem:[#allocation47_spill] sm:$0xff] }
  0xe5   :  { %4055 = vst [vmem:[#allocation48_spill] sm:$0xff] %v2742_v60  ;;  %v786_v26 = vadd.f32 %v785_v17, %v622_v23  ;;  %v2752_v38 = vsub.f32 %v4056_v50, %v2490_v46  ;;  %v2756_v18 = vsub.f32 %v4058_v13, %v2490_v46  ;;  %v631_v24 = vmul.f32 %v2731_v28, %v2731_v28  ;;  %v4062_v23 = vld [vmem:[#allocation50_spill] sm:$0xff]  ;;  %v4064_v50 = vld [vmem:[#allocation55_spill] sm:$0xff]  ;;  %v4066_v13 = vld [vmem:[#allocation56_spill] sm:$0xff] }
  0xe6   :  { %v793_v55 = vadd.f32 %v792_v43, %v627_v14  ;;  %v2762_v9 = vsub.f32 %v4060_v53, %v2490_v46  ;;  %v2766_v0 = vsub.f32 %v4062_v23, %v2490_v46  ;;  %v2770_v61 = vsub.f32 %v4064_v50, %v2490_v46  ;;  %v4068_v28 = vld [vmem:[#allocation60_spill] sm:$0xff] }
  0xe7   :  { %4057 = vst [vmem:[#allocation49_spill] sm:$0xff] %v2752_v38  ;;  %4059 = vst [vmem:[#allocation54_spill] sm:$0xff] %v2756_v18  ;;  %v787_v17 = vadd.f32 %v786_v26, %v623_v20  ;;  %v2774_v37 = vsub.f32 %v4066_v13, %v2490_v46  ;;  %v2778_v43 = vsub.f32 %v4068_v28, %v2490_v46  ;;  %v2786_v20 = vmul.f32 0.0012755102, %v338_v33 }
  0xe8   :  { %4061 = vst [vmem:[#allocation44_spill] sm:$0xff] %v2762_v9  ;;  %4063 = vst [vmem:[#allocation46_spill] sm:$0xff] %v2766_v0  ;;  %v794_v14 = vadd.f32 %v793_v55, %v628_v15  ;;  %v632_v53 = vmul.f32 %v2752_v38, %v2752_v38  ;;  %v633_v23 = vmul.f32 %v2756_v18, %v2756_v18  ;;  %v4070_v38 = vld [vmem:[#allocation51_spill] sm:$0xff]  ;;  %v797_v33 = vsel %vm181_vm0, %v631_v24, 0.0 }
  0xe9   :  { %4065 = vst [vmem:[#allocation47_spill] sm:$0xff] %v2770_v61  ;;  %4067 = vst [vmem:[#allocation50_spill] sm:$0xff] %v2774_v37  ;;  %v634_v26 = vmul.f32 %v2762_v9, %v2762_v9  ;;  %v789_v50 = vadd.f32 %v788_v27, %v787_v17  ;;  %v630_v13 = vmul.f32 %v2742_v60, %v2742_v60  ;;  %v4072_v27 = vld [vmem:[#allocation52_spill] sm:$0xff]  ;;  %v4074_v60 = vld [vmem:[#allocation53_spill] sm:$0xff] }
  0xea   :  { %4069 = vst [vmem:[#allocation55_spill] sm:$0xff] %v2778_v43  ;;  %v635_v46 = vmul.f32 %v2766_v0, %v2766_v0  ;;  %v795_v28 = vadd.f32 %v794_v14, %v629_v41  ;;  %v638_v55 = vmul.f32 %v2778_v43, %v2778_v43  ;;  %v801_v15 = vadd.f32 %v633_v23, %v632_v53  ;;  %v4076_v41 = vld [vmem:[#allocation57_spill] sm:$0xff]  ;;  %v4080_v43 = vld [vmem:[#allocation66_spill] sm:$0xff] }
  0xeb   :  { %v2796_v18 = vsub.f32 %v4070_v38, %v2514_v39  ;;  %790 = vadd.xlane.f32.xlu0 %v789_v50  ;;  %v2801_v17 = vsub.f32 %v4072_v27, %v2514_v39  ;;  %v2805_v9 = vsub.f32 %v4074_v60, %v2514_v39  ;;  %v2809_v14 = vsub.f32 %v4076_v41, %v2514_v39  ;;  %v4078_v50 = vld [vmem:[#allocation61_spill] sm:$0xff] }
  0xec   :  { %v796_v53 = vadd.f32 %v795_v28, %v630_v13  ;;  %v636_v38 = vmul.f32 %v2770_v61, %v2770_v61  ;;  %v637_v23 = vmul.f32 %v2774_v37, %v2774_v37  ;;  %v802_v24 = vadd.f32 %v801_v15, %v634_v26  ;;  %v4082_v26 = vld [vmem:[#allocation63_spill] sm:$0xff] }
  0xed   :  { %4071 = vst [vmem:[#allocation56_spill] sm:$0xff] %v2796_v18  ;;  %4073 = vst [vmem:[#allocation60_spill] sm:$0xff] %v2801_v17  ;;  %v2817_v27 = vsub.f32 %v4078_v50, %v2514_v39  ;;  %v2821_v60 = vsub.f32 %v4080_v43, %v2514_v39  ;;  %v639_v41 = vmul.f32 %v2796_v18, %v2796_v18  ;;  %v806_v0 = vsel %vm181_vm0, %v638_v55, 0.0  ;;  %v4084_v18 = vld [vmem:[#allocation58_spill] sm:$0xff] }
  0xee   :  { %4075 = vst [vmem:[#allocation51_spill] sm:$0xff] %v2805_v9  ;;  %4077 = vst [vmem:[#allocation52_spill] sm:$0xff] %v2809_v14  ;;  %v640_v13 = vmul.f32 %v2801_v17, %v2801_v17  ;;  %v798_v28 = vadd.f32 %v797_v33, %v796_v53  ;;  %v803_v61 = vadd.f32 %v802_v24, %v635_v46  ;;  %v4086_v46 = vld [vmem:[#allocation59_spill] sm:$0xff]  ;;  %v4089_v24 = vld [vmem:[#allocation64_spill] sm:$0xff] }
  0xef   :  { %4079 = vst [vmem:[#allocation53_spill] sm:$0xff] %v2817_v27  ;;  %4081 = vst [vmem:[#allocation57_spill] sm:$0xff] %v2821_v60  ;;  %v2830_v15 = vsub.f32 %v4082_v26, %v2514_v39  ;;  %v641_v50 = vmul.f32 %v2805_v9, %v2805_v9  ;;  %v642_v43 = vmul.f32 %v2809_v14, %v2809_v14  ;;  %v4088_v39 = vld [vmem:[#allocation62_spill] sm:$0xff] }
  0xf0   :  { %v810_v37 = vadd.f32 %v640_v13, %v639_v41  ;;  %v2838_v29 = vsub.f32 %v4084_v18, %v2539_v54  ;;  %799 = vadd.xlane.f32.xlu1 %v798_v28  ;;  %v804_v33 = vadd.f32 %v803_v61, %v636_v38  ;;  %v2842_v55 = vsub.f32 %v4086_v46, %v2539_v54  ;;  %v4091_v61 = vld [vmem:[#allocation69_spill] sm:$0xff]  ;;  %v4093_v46 = vld [vmem:[#allocation70_spill] sm:$0xff] }
  0xf1   :  { %4083 = vst [vmem:[#allocation61_spill] sm:$0xff] %v2830_v15  ;;  %v2846_v53 = vsub.f32 %v4088_v39, %v2539_v54  ;;  %v2850_v26 = vsub.f32 %v4089_v24, %v2539_v54  ;;  %v643_v41 = vmul.f32 %v2817_v27, %v2817_v27  ;;  %v645_v18 = vmul.f32 %v2821_v60, %v2821_v60  ;;  %v347_v27 = vpop.xlane.xlu0 %346 }
  0xf2   :  { %4085 = vst [vmem:[#allocation66_spill] sm:$0xff] %v2838_v29  ;;  %4087 = vst [vmem:[#allocation63_spill] sm:$0xff] %v2842_v55  ;;  %v811_v13 = vadd.f32 %v810_v37, %v641_v50  ;;  %v2858_v38 = vsub.f32 %v4091_v61, %v2539_v54  ;;  %v805_v28 = vadd.f32 %v804_v33, %v637_v23  ;;  %v4095_v50 = vld [vmem:[#allocation75_spill] sm:$0xff] }
  0xf3   :  { %4090 = vst [vmem:[#allocation58_spill] sm:$0xff] %v2850_v26  ;;  %v2862_v39 = vsub.f32 %v4093_v46, %v2539_v54  ;;  %v646_v24 = vmul.f32 %v2838_v29, %v2838_v29  ;;  %v647_v14 = vmul.f32 %v2842_v55, %v2842_v55  ;;  %v644_v60 = vmul.f32 %v2830_v15, %v2830_v15  ;;  %v4097_v29 = vld [vmem:[#allocation65_spill] sm:$0xff] }
  0xf4   :  { %4092 = vst [vmem:[#allocation59_spill] sm:$0xff] %v2858_v38  ;;  %v812_v37 = vadd.f32 %v811_v13, %v642_v43  ;;  %v2872_v61 = vsub.f32 %v4095_v50, %v2539_v54  ;;  %v648_v23 = vmul.f32 %v2846_v53, %v2846_v53  ;;  %v807_v33 = vadd.f32 %v806_v0, %v805_v28  ;;  %v4099_v43 = vld [vmem:[#allocation67_spill] sm:$0xff]  ;;  %v4101_v13 = vld [vmem:[#allocation68_spill] sm:$0xff] }
  0xf5   :  { %4094 = vst [vmem:[#allocation62_spill] sm:$0xff] %v2862_v39  ;;  %v649_v46 = vmul.f32 %v2850_v26, %v2850_v26  ;;  %v652_v9 = vmul.f32 %v2862_v39, %v2862_v39  ;;  %v819_v17 = vadd.f32 %v647_v14, %v646_v24  ;;  %v2882_v15 = vsub.f32 %v4097_v29, %v2555_v19  ;;  %v4103_v29 = vld [vmem:[#allocation71_spill] sm:$0xff] }
  0xf6   :  { %4096 = vst [vmem:[#allocation64_spill] sm:$0xff] %v2872_v61  ;;  %v813_v55 = vadd.f32 %v812_v37, %v643_v41  ;;  %v2886_v54 = vsub.f32 %v4099_v43, %v2555_v19  ;;  %v2890_v50 = vsub.f32 %v4101_v13, %v2555_v19  ;;  %v2892_v0 = vmul.f32 0.0012755102, %v347_v27  ;;  %808 = vadd.xlane.f32.xlu0 %v807_v33  ;;  %v4105_v43 = vld [vmem:[#allocation76_spill] sm:$0xff]  ;;  %v4107_v13 = vld [vmem:[#allocation81_spill] sm:$0xff] }
  0xf7   :  { %4098 = vst [vmem:[#allocation69_spill] sm:$0xff] %v2882_v15  ;;  %v815_v28 = vsel %vm181_vm0, %v645_v18, 0.0  ;;  %v650_v14 = vmul.f32 %v2858_v38, %v2858_v38  ;;  %v820_v41 = vadd.f32 %v819_v17, %v648_v23  ;;  %v2899_v37 = vsub.f32 %v4103_v29, %v2555_v19  ;;  %v4109_v23 = vld [vmem:[#allocation77_spill] sm:$0xff] }
  0xf8   :  { %4100 = vst [vmem:[#allocation70_spill] sm:$0xff] %v2886_v54  ;;  %4102 = vst [vmem:[#allocation75_spill] sm:$0xff] %v2890_v50  ;;  %v814_v24 = vadd.f32 %v813_v55, %v644_v60  ;;  %v2903_v39 = vsub.f32 %v4105_v43, %v2555_v19  ;;  %v653_v27 = vmul.f32 %v2882_v15, %v2882_v15  ;;  %v824_v55 = vsel %vm181_vm0, %v652_v9, 0.0 }
  0xf9   :  { %4104 = vst [vmem:[#allocation65_spill] sm:$0xff] %v2899_v37  ;;  %v651_v33 = vmul.f32 %v2872_v61, %v2872_v61  ;;  %v821_v18 = vadd.f32 %v820_v41, %v649_v46  ;;  %v2911_v38 = vsub.f32 %v4107_v13, %v2555_v19  ;;  %v654_v17 = vmul.f32 %v2886_v54, %v2886_v54  ;;  %v4111_v46 = vld [vmem:[#allocation72_spill] sm:$0xff]  ;;  %v4112_v13 = vld [vmem:[#allocation73_spill] sm:$0xff] }
  0xfa   :  { %4106 = vst [vmem:[#allocation67_spill] sm:$0xff] %v2903_v39  ;;  %v816_v60 = vadd.f32 %v815_v28, %v814_v24  ;;  %v2918_v29 = vsub.f32 %v4109_v23, %v2555_v19  ;;  %v655_v43 = vmul.f32 %v2890_v50, %v2890_v50  ;;  %v2924_v41 = vsub.f32 %v4111_v46, %v2606_v45  ;;  %v4114_v28 = vld [vmem:[#allocation74_spill] sm:$0xff]  ;;  %v4123_v50 = vld [vmem:[#allocation79_spill] sm:$0xff] }
  0xfb   :  { %4108 = vst [vmem:[#allocation68_spill] sm:$0xff] %v2911_v38  ;;  %v822_v15 = vadd.f32 %v821_v18, %v650_v14  ;;  %v828_v61 = vadd.f32 %v654_v17, %v653_v27  ;;  %v2928_v26 = vsub.f32 %v4112_v13, %v2606_v45  ;;  %v656_v9 = vmul.f32 %v2899_v37, %v2899_v37  ;;  %v4116_v14 = vld [vmem:[#allocation78_spill] sm:$0xff] }
  0xfc   :  { %4110 = vst [vmem:[#allocation71_spill] sm:$0xff] %v2918_v29  ;;  %817 = vadd.xlane.f32.xlu1 %v816_v60  ;;  %v657_v19 = vmul.f32 %v2903_v39, %v2903_v39  ;;  %v2936_v24 = vsub.f32 %v4114_v28, %v2606_v45  ;;  %v2940_v27 = vsub.f32 %v4116_v14, %v2606_v45  ;;  %v4117_v60 = vld [vmem:[#allocation87_spill] sm:$0xff]  ;;  %v4119_v13 = vld [vmem:[#allocation82_spill] sm:$0xff] }
  0xfd   :  { %4113 = vst [vmem:[#allocation76_spill] sm:$0xff] %v2928_v26  ;;  %v823_v18 = vadd.f32 %v822_v15, %v651_v33  ;;  %v659_v17 = vmul.f32 %v2911_v38, %v2911_v38  ;;  %v829_v23 = vadd.f32 %v828_v61, %v655_v43  ;;  %v2946_v46 = vsub.f32 %v4117_v60, %v2606_v45  ;;  %v4121_v61 = vld [vmem:[#allocation84_spill] sm:$0xff] }
  0xfe   :  { %4115 = vst [vmem:[#allocation81_spill] sm:$0xff] %v2936_v24  ;;  %v2950_v39 = vsub.f32 %v4119_v13, %v2606_v45  ;;  %v660_v28 = vmul.f32 %v2924_v41, %v2924_v41  ;;  %v661_v14 = vmul.f32 %v2928_v26, %v2928_v26  ;;  %v662_v15 = vmul.f32 %v2936_v24, %v2936_v24  ;;  %v4125_v26 = vld [vmem:[#allocation80_spill] sm:$0xff] }
  0xff   :  { %4118 = vst [vmem:[#allocation77_spill] sm:$0xff] %v2946_v46  ;;  %v825_v33 = vadd.f32 %v824_v55, %v823_v18  ;;  %v830_v38 = vadd.f32 %v829_v23, %v656_v9  ;;  %v2960_v43 = vsub.f32 %v4121_v61, %v2606_v45  ;;  %v663_v60 = vmul.f32 %v2940_v27, %v2940_v27  ;;  %v4127_v18 = vld [vmem:[#allocation83_spill] sm:$0xff] }
 0x100   :  { %4120 = vst [vmem:[#allocation72_spill] sm:$0xff] %v2950_v39  ;;  %v666_v13 = vmul.f32 %v2946_v46, %v2946_v46  ;;  %v837_v37 = vadd.f32 %v661_v14, %v660_v28  ;;  %v2968_v54 = vsub.f32 %v4123_v50, %v2651_v51  ;;  %v2972_v24 = vsub.f32 %v4125_v26, %v2651_v51  ;;  %v4129_v14 = vld [vmem:[#allocation85_spill] sm:$0xff]  ;;  %v4131_v26 = vld [vmem:[#allocation90_spill] sm:$0xff] }
 0x101   :  { %4122 = vst [vmem:[#allocation73_spill] sm:$0xff] %v2960_v43  ;;  %826 = vadd.xlane.f32.xlu0 %v825_v33  ;;  %v658_v45 = vmul.f32 %v2918_v29, %v2918_v29  ;;  %v831_v55 = vadd.f32 %v830_v38, %v657_v19  ;;  %v833_v9 = vsel %vm181_vm0, %v659_v17, 0.0  ;;  %v2979_v23 = vsub.f32 %v4127_v18, %v2651_v51 }
 0x102   :  { %4124 = vst [vmem:[#allocation74_spill] sm:$0xff] %v2968_v54  ;;  %4126 = vst [vmem:[#allocation78_spill] sm:$0xff] %v2972_v24  ;;  %v664_v28 = vmul.f32 %v2950_v39, %v2950_v39  ;;  %v838_v50 = vadd.f32 %v837_v37, %v662_v15  ;;  %v2985_v61 = vsub.f32 %v4129_v14, %v2651_v51  ;;  %v842_v18 = vsel %vm181_vm0, %v666_v13, 0.0  ;;  %v4134_v14 = vld [vmem:[#allocation91_spill] sm:$0xff]  ;;  %v4137_v39 = vld [vmem:[#allocation88_spill] sm:$0xff] }
 0x103   :  { %4128 = vst [vmem:[#allocation87_spill] sm:$0xff] %v2979_v23  ;;  %v2989_v33 = vsub.f32 %v4131_v26, %v2651_v51  ;;  %v832_v29 = vadd.f32 %v831_v55, %v658_v45  ;;  %v2993_v38 = vsub.f32 %v2220_v44, %v2651_v51  ;;  %v667_v19 = vmul.f32 %v2968_v54, %v2968_v54  ;;  %v4136_v54 = vld [vmem:[#allocation86_spill] sm:$0xff] }
 0x104   :  { %4130 = vst [vmem:[#allocation82_spill] sm:$0xff] %v2985_v61  ;;  %v668_v17 = vmul.f32 %v2972_v24, %v2972_v24  ;;  %v665_v37 = vmul.f32 %v2960_v43, %v2960_v43  ;;  %v839_v15 = vadd.f32 %v838_v50, %v663_v60  ;;  %v3004_v26 = vsub.f32 %v4134_v14, %v2651_v51  ;;  %v4138_v60 = vld [vmem:[#allocation89_spill] sm:$0xff]  ;;  %v4139_v51 = vld [vmem:[#allocation92_spill] sm:$0xff] }
 0x105   :  { %4132 = vst [vmem:[#allocation84_spill] sm:$0xff] %v2989_v33  ;;  %4133 = vst [vmem:[#allocation79_spill] sm:$0xff] %v2993_v38  ;;  %v834_v45 = vadd.f32 %v833_v9, %v832_v29  ;;  %v669_v44 = vmul.f32 %v2979_v23, %v2979_v23  ;;  %v3010_v46 = vsub.f32 %v4136_v54, %v2786_v20  ;;  %v4149_v23 = vld [vmem:[#allocation95_spill] sm:$0xff] }
 0x106   :  { %4135 = vst [vmem:[#allocation80_spill] sm:$0xff] %v3004_v26  ;;  %v846_v55 = vadd.f32 %v668_v17, %v667_v19  ;;  %v840_v24 = vadd.f32 %v839_v15, %v664_v28  ;;  %v3014_v43 = vsub.f32 %v4137_v39, %v2786_v20  ;;  %v3018_v13 = vsub.f32 %v4138_v60, %v2786_v20  ;;  %v4140_v19 = vld [vmem:[#allocation96_spill] sm:$0xff] }
 0x107   :  { %v3022_v29 = vsub.f32 %v4139_v51, %v2786_v20  ;;  %835 = vadd.xlane.f32.xlu1 %v834_v45  ;;  %v670_v9 = vmul.f32 %v2985_v61, %v2985_v61  ;;  %v671_v54 = vmul.f32 %v2989_v33, %v2989_v33  ;;  %v672_v28 = vmul.f32 %v2993_v38, %v2993_v38  ;;  %v356_v45 = vpop.xlane.xlu1 %355 }
 0x108   :  { %v847_v39 = vadd.f32 %v846_v55, %v669_v44  ;;  %v841_v50 = vadd.f32 %v840_v24, %v665_v37  ;;  %v3032_v17 = vsub.f32 %v4140_v19, %v2786_v20  ;;  %v674_v15 = vmul.f32 %v3010_v46, %v3010_v46  ;;  %v4143_v44 = vld [vmem:[#allocation100_spill] sm:$0xff] }
 0x109   :  { %v675_v14 = vmul.f32 %v3014_v43, %v3014_v43  ;;  %v673_v60 = vmul.f32 %v3004_v26, %v3004_v26  ;;  %v3042_v38 = vsub.f32 %v2239_v11, %v2786_v20  ;;  %v676_v24 = vmul.f32 %v3018_v13, %v3018_v13  ;;  %v4145_v26 = vld [vmem:[#allocation93_spill] sm:$0xff]  ;;  %v4147_v11 = vld [vmem:[#allocation94_spill] sm:$0xff] }
 0x10a   :  { %4141 = vst [vmem:[#allocation83_spill] sm:$0xff] %v3032_v17  ;;  %v848_v51 = vadd.f32 %v847_v39, %v670_v9  ;;  %v843_v37 = vadd.f32 %v842_v18, %v841_v50  ;;  %v3048_v55 = vsub.f32 %v4143_v44, %v2786_v20  ;;  %v677_v19 = vmul.f32 %v3022_v29, %v3022_v29 }
 0x10b   :  { %4142 = vst [vmem:[#allocation85_spill] sm:$0xff] %v3042_v38  ;;  %v855_v33 = vadd.f32 %v675_v14, %v674_v15  ;;  %v3054_v9 = vsub.f32 %v4145_v26, %v2892_v0  ;;  %v3058_v39 = vsub.f32 %v4147_v11, %v2892_v0  ;;  %v3062_v18 = vsub.f32 %v4149_v23, %v2892_v0 }
 0x10c   :  { %4144 = vst [vmem:[#allocation90_spill] sm:$0xff] %v3048_v55  ;;  %v849_v61 = vadd.f32 %v848_v51, %v671_v54  ;;  %v406_v50 = vmul.f32 0.0012755102, %v356_v45  ;;  %844 = vadd.xlane.f32.xlu0 %v843_v37  ;;  %v678_v20 = vmul.f32 %v3032_v17, %v3032_v17  ;;  %v851_v54 = vsel %vm181_vm0, %v673_v60, 0.0  ;;  %v4151_v45 = vld [vmem:[#allocation97_spill] sm:$0xff]  ;;  %v4160_v17 = vld [vmem:[#allocation103_spill] sm:$0xff] }
 0x10d   :  { %4146 = vst [vmem:[#allocation91_spill] sm:$0xff] %v3054_v9  ;;  %4148 = vst [vmem:[#allocation86_spill] sm:$0xff] %v3058_v39  ;;  %v856_v44 = vadd.f32 %v855_v33, %v676_v24  ;;  %v680_v26 = vmul.f32 %v3042_v38, %v3042_v38  ;;  %v681_v14 = vmul.f32 %v3054_v9, %v3054_v9  ;;  %v4153_v38 = vld [vmem:[#allocation98_spill] sm:$0xff] }
 0x10e   :  { %4150 = vst [vmem:[#allocation88_spill] sm:$0xff] %v3062_v18  ;;  %v850_v15 = vadd.f32 %v849_v61, %v672_v28  ;;  %v679_v51 = vmul.f32 %v3048_v55, %v3048_v55  ;;  %v3075_v37 = vsub.f32 %v4151_v45, %v2892_v0  ;;  %v682_v33 = vmul.f32 %v3058_v39, %v3058_v39  ;;  %v4152_v28 = vld [vmem:[#allocation102_spill] sm:$0xff] }
 0x10f   :  { %v857_v23 = vadd.f32 %v856_v44, %v677_v19  ;;  %v3081_v60 = vsub.f32 %v4152_v28, %v2892_v0  ;;  %v683_v24 = vmul.f32 %v3062_v18, %v3062_v18  ;;  %v3086_v55 = vsub.f32 %v4153_v38, %v406_v50  ;;  %v4155_v19 = vld [vmem:[#allocation99_spill] sm:$0xff]  ;;  %v4158_v28 = vld [vmem:[#allocation101_spill] sm:$0xff] }
 0x110   :  { %v852_v61 = vadd.f32 %v851_v54, %v850_v15  ;;  %v864_v9 = vadd.f32 %v682_v33, %v681_v14  ;;  %v3089_v44 = vsub.f32 %v4155_v19, %v406_v50  ;;  %v860_v45 = vsel %vm181_vm0, %v680_v26, 0.0  ;;  %v4157_v15 = vld [vmem:[#allocation104_spill] sm:$0xff] }
 0x111   :  { %v858_v11 = vadd.f32 %v857_v23, %v678_v20  ;;  %4154 = vst [vmem:[#allocation89_spill] sm:$0xff] %v3086_v55  ;;  %v3094_v54 = vsub.f32 %v4157_v15, %v2892_v0  ;;  %v3097_v39 = vsub.f32 %v4158_v28, %v406_v50  ;;  %v3100_v18 = vsub.f32 %v4160_v17, %v406_v50 }
 0x112   :  { %4156 = vst [vmem:[#allocation92_spill] sm:$0xff] %v3089_v44  ;;  %853 = vadd.xlane.f32.xlu1 %v852_v61  ;;  %v3104_v38 = vsub.f32 %v2259_v32, %v2892_v0  ;;  %v684_v14 = vmul.f32 %v3075_v37, %v3075_v37  ;;  %v865_v23 = vadd.f32 %v864_v9, %v683_v24 }
 0x113   :  { %4159 = vst [vmem:[#allocation96_spill] sm:$0xff] %v3097_v39  ;;  %4161 = vst [vmem:[#allocation100_spill] sm:$0xff] %v3100_v18  ;;  %v859_v20 = vadd.f32 %v858_v11, %v679_v51  ;;  %v3109_v26 = vsub.f32 %v2261_v57, %v406_v50  ;;  %v688_v33 = vmul.f32 %v3086_v55, %v3086_v55 }
 0x114   :  { %v689_v61 = vmul.f32 %v3089_v44, %v3089_v44  ;;  %v690_v17 = vmul.f32 %v3097_v39, %v3097_v39  ;;  %v685_v32 = vmul.f32 %v3081_v60, %v3081_v60  ;;  %v866_v0 = vadd.f32 %v865_v23, %v684_v14 }
 0x115   :  { %4162 = vst [vmem:[#allocation93_spill] sm:$0xff] %v3109_v26  ;;  %v861_v51 = vadd.f32 %v860_v45, %v859_v20  ;;  %v3120_v11 = vsub.f32 %v2265_v25, %v406_v50  ;;  %v687_v57 = vmul.f32 %v3094_v54, %v3094_v54  ;;  %v3125_v9 = vsub.f32 %v2270_v47, %v406_v50 }
 0x116   :  { %v691_v24 = vmul.f32 %v3100_v18, %v3100_v18  ;;  %v873_v19 = vadd.f32 %v689_v61, %v688_v33  ;;  %v686_v45 = vmul.f32 %v3104_v38, %v3104_v38  ;;  %v867_v15 = vadd.f32 %v866_v0, %v685_v32 }
 0x117   :  { %4163 = vst [vmem:[#allocation94_spill] sm:$0xff] %v3120_v11  ;;  %4164 = vst [vmem:[#allocation95_spill] sm:$0xff] %v3125_v9  ;;  %862 = vadd.xlane.f32.xlu0 %v861_v51  ;;  %v692_v28 = vmul.f32 %v3109_v26, %v3109_v26  ;;  %v694_v14 = vmul.f32 %v3120_v11, %v3120_v11  ;;  %v869_v47 = vsel %vm181_vm0, %v687_v57, 0.0  ;;  %v1274_v57 = vld [vmem:[%s3662_s2 + $0x28] sm:$0xff] }
 0x118   :  { %v874_v25 = vadd.f32 %v873_v19, %v690_v17  ;;  %v868_v20 = vadd.f32 %v867_v15, %v686_v45  ;;  %v693_v50 = vmul.f32 %v3125_v9, %v3125_v9  ;;  %v1272_v17 = vld [vmem:[%s3662_s2 + $0x18] sm:$0xff]  ;;  %v1271_v19 = vld [vmem:[%s3662_s2 + $0x10] sm:$0xff]  ;;  %v1278_v45 = vld [vmem:[%s3662_s2 + $0x48] sm:$0xff] }
 0x119   :  { %v878_v51 = vsel %vm181_vm0, %v694_v14, 0.0  ;;  %v1273_v15 = vld [vmem:[%s3662_s2 + $0x20] sm:$0xff] }
 0x11a   :  { %v875_v23 = vadd.f32 %v874_v25, %v691_v24  ;;  %v870_v33 = vadd.f32 %v869_v47, %v868_v20  ;;  %v1276_v24 = vld [vmem:[%s3662_s2 + $0x38] sm:$0xff]  ;;  %v1275_v25 = vld [vmem:[%s3662_s2 + $0x30] sm:$0xff]  ;;  %v1282_v20 = vld [vmem:[%s3662_s2 + $0x68] sm:$0xff]  ;;  %v3169_v47 = vpop.permute.xlu1 %1297 }
 0x11b   :  { %v1277_v14 = vld [vmem:[%s3662_s2 + $0x40] sm:$0xff] }
 0x11c   :  { %v876_v61 = vadd.f32 %v875_v23, %v692_v28  ;;  %871 = vadd.xlane.f32.xlu1 %v870_v33  ;;  %v1280_v28 = vld [vmem:[%s3662_s2 + $0x58] sm:$0xff]  ;;  %v1279_v23 = vld [vmem:[%s3662_s2 + $0x50] sm:$0xff] }
 0x11e   :  { %v877_v32 = vadd.f32 %v876_v61, %v693_v50  ;;  %v1284_v50 = vld [vmem:[%s3662_s2 + $0x78] sm:$0xff]  ;;  %v1286_v61 = vld [vmem:[%s3662_s2 + $0x88] sm:$0xff] }
 0x120   :  { %v879_v0 = vadd.f32 %v878_v51, %v877_v32  ;;  %v1281_v32 = vld [vmem:[%s3662_s2 + $0x60] sm:$0xff] }
 0x122   :  { %880 = vadd.xlane.f32.xlu0 %v879_v0  ;;  %v365_v0 = vpop.xlane.xlu0 %364 }
 0x12d   :  { %1307 = vperm.xlu1 %1712, %v1272_v17  }
 0x131   :  { %1317 = vperm.xlu1 %1712, %v1274_v57   ;;  %v407_v57 = vmul.f32 0.0012755102, %v365_v0 }
 0x135   :  { %1327 = vperm.xlu1 %1712, %v1276_v24   ;;  %v1283_v24 = vld [vmem:[%s3662_s2 + $0x70] sm:$0xff] }
 0x138   :  { %1302 = vperm.xlu0 %1711, %v1271_v19   ;;  %v1755_v19 = vld [vmem:[#allocation2 + $0x460] sm:$0xff] }
 0x139   :  { %1337 = vperm.xlu1 %1712, %v1278_v45   ;;  %v3186_v45 = vsub.f32 %v1755_v19, %v407_v57  ;;  %v3209_v19 = vpop.permute.xlu0 %1292 }
 0x13b   :  { %4165 = vst [vmem:[#allocation97_spill] sm:$0xff] %v3186_v45 }
 0x13c   :  { %1312 = vperm.xlu0 %1711, %v1273_v15   ;;  %v1756_v15 = vld [vmem:[#allocation2 + $0x468] sm:$0xff] }
 0x13d   :  { %1347 = vperm.xlu1 %1712, %v1280_v28   ;;  %v3188_v28 = vsub.f32 %v1756_v15, %v407_v57 }
 0x13f   :  { %4166 = vst [vmem:[#allocation102_spill] sm:$0xff] %v3188_v28 }
 0x140   :  { %1322 = vperm.xlu0 %1711, %v1275_v25   ;;  %v1285_v25 = vld [vmem:[%s3662_s2 + $0x80] sm:$0xff] }
 0x141   :  { %1357 = vperm.xlu1 %1712, %v1282_v20   ;;  %v1757_v20 = vld [vmem:[#allocation2 + $0x470] sm:$0xff] }
 0x142   :  { %v710_v33 = vpop.xlane.xlu1 %709 }
 0x143   :  { %v912_v51 = vmul.f32 0.0012755102, %v710_v33  ;;  %v1287_v33 = vld [vmem:[%s3662_s2 + $0x90] sm:$0xff] }
 0x144   :  { %1332 = vperm.xlu0 %1711, %v1277_v14   ;;  %v3193_v14 = vsub.f32 %v1757_v20, %v407_v57 }
 0x145   :  { %1367 = vperm.xlu1 %1712, %v1284_v50   ;;  %v933_v17 = vadd.f32 1e-05, %v912_v51  ;;  %v695_v50 = vmul.f32 %v3186_v45, %v3186_v45 }
 0x146   :  { %4167 = vst [vmem:[#allocation98_spill] sm:$0xff] %v3193_v14 }
 0x147   :  { %1713 = vrsqrt.f32 %v933_v17  ;;  %v697_v17 = vmul.f32 %v3193_v14, %v3193_v14 }
 0x148   :  { %1342 = vperm.xlu0 %1711, %v1279_v23   ;;  %v696_v23 = vmul.f32 %v3188_v28, %v3188_v28 }
 0x149   :  { %1377 = vperm.xlu1 %1712, %v1286_v61   ;;  %v975_v61 = vld [vmem:[%s3661_s1] sm:$0xff] }
 0x14b   :  { %v719_v28 = vpop.xlane.xlu0 %718 }
 0x14c   :  { %1352 = vperm.xlu0 %1711, %v1281_v32   ;;  %v1758_v32 = vld [vmem:[#allocation2 + $0x478] sm:$0xff] }
 0x14d   :  { %v3205_v0 = vsub.f32 %v1758_v32, %v407_v57 }
 0x14f   :  { %4168 = vst [vmem:[#allocation99_spill] sm:$0xff] %v3205_v0  ;;  %v698_v11 = vmul.f32 %v3205_v0, %v3205_v0 }
 0x150   :  { %1362 = vperm.xlu0 %1711, %v1283_v24   ;;  %v882_v24 = vadd.f32 %v696_v23, %v695_v50  ;;  %v1761_v50 = vld [vmem:[#allocation2 + $0x490] sm:$0xff]  ;;  %v737_v26 = vpop.xlane.xlu0 %736 }
 0x151   :  { %v3219_v23 = vsub.f32 %v1761_v50, %v407_v57 }
 0x152   :  { %v883_v9 = vadd.f32 %v882_v24, %v697_v17  ;;  %v728_v24 = vpop.xlane.xlu1 %727 }
 0x153   :  { %4171 = vst [vmem:[#allocation103_spill] sm:$0xff] %v3219_v23  ;;  %v701_v17 = vmul.f32 %v3219_v23, %v3219_v23  ;;  %v914_v18 = vmul.f32 0.0012755102, %v728_v24 }
 0x154   :  { %1372 = vperm.xlu0 %1711, %v1285_v25   ;;  %v1714_v51 = vpop.eup %1713  ;;  %v1759_v25 = vld [vmem:[#allocation2 + $0x480] sm:$0xff]  ;;  %v884_v14 = vadd.f32 %v883_v9, %v698_v11  ;;  %v915_v11 = vmul.f32 0.0012755102, %v737_v26  ;;  %v976_v26 = vld [vmem:[%s3661_s1 + $0x8] sm:$0xff] }
 0x155   :  { %v996_v15 = vmul.f32 %v1714_v51, %v975_v61  ;;  %v3211_v20 = vsub.f32 %v1759_v25, %v407_v57  ;;  %v913_v61 = vmul.f32 0.0012755102, %v719_v28  ;;  %v887_v0 = vsel %vm181_vm0, %v701_v17, 0.0 }
 0x156   :  { %v936_v50 = vadd.f32 1e-05, %v915_v11 }
 0x157   :  { %4169 = vst [vmem:[#allocation104_spill] sm:$0xff] %v3211_v20  ;;  %v699_v32 = vmul.f32 %v3211_v20, %v3211_v20  ;;  %v746_v28 = vpop.xlane.xlu1 %745 }
 0x158   :  { %1382 = vperm.xlu0 %1711, %v1287_v33   ;;  %v1760_v33 = vld [vmem:[#allocation2 + $0x488] sm:$0xff] }
 0x159   :  { %v3215_v45 = vsub.f32 %v1760_v33, %v407_v57  ;;  %v885_v25 = vadd.f32 %v884_v14, %v699_v32  ;;  %v935_v57 = vadd.f32 1e-05, %v914_v18 }
 0x15b   :  { %4170 = vst [vmem:[#allocation101_spill] sm:$0xff] %v3215_v45  ;;  %v700_v51 = vmul.f32 %v3215_v45, %v3215_v45  ;;  %v916_v45 = vmul.f32 0.0012755102, %v746_v28 }
 0x15c   :  { %1019 = vperm.xlu0 %1711, %v996_v15   ;;  %v934_v15 = vadd.f32 1e-05, %v913_v61  ;;  %v755_v20 = vpop.xlane.xlu0 %754 }
 0x15d   :  { %v886_v33 = vadd.f32 %v885_v25, %v700_v51  ;;  %v917_v32 = vmul.f32 0.0012755102, %v755_v20  ;;  %v937_v23 = vadd.f32 1e-05, %v916_v45  ;;  %v977_v45 = vld [vmem:[%s3661_s1 + $0x10] sm:$0xff] }
 0x15e   :  { %1715 = vrsqrt.f32 %v934_v15 }
 0x15f   :  { %v888_v9 = vadd.f32 %v887_v0, %v886_v33  ;;  %1717 = vrsqrt.f32 %v935_v57  ;;  %v938_v61 = vadd.f32 1e-05, %v917_v32 }
 0x160   :  { %1719 = vrsqrt.f32 %v936_v50 }
 0x161   :  { %1721 = vrsqrt.f32 %v937_v23 }
 0x162   :  { %v764_v39 = vpop.xlane.xlu1 %763  ;;  %1723 = vrsqrt.f32 %v938_v61 }
 0x163   :  { %v918_v18 = vmul.f32 0.0012755102, %v764_v39  ;;  %v978_v39 = vld [vmem:[%s3661_s1 + $0x18] sm:$0xff] }
 0x165   :  { %v939_v20 = vadd.f32 1e-05, %v918_v18  ;;  %v979_v18 = vld [vmem:[%s3661_s1 + $0x20] sm:$0xff] }
 0x168   :  { %v773_v14 = vpop.xlane.xlu0 %772 }
 0x169   :  { %v919_v15 = vmul.f32 0.0012755102, %v773_v14 }
 0x16b   :  { %v1716_v17 = vpop.eup %1715 }
 0x16c   :  { %v997_v33 = vmul.f32 %v1716_v17, %v976_v26  ;;  %v1718_v11 = vpop.eup %1717 }
 0x16d   :  { %889 = vadd.xlane.f32.xlu1 %v888_v9  ;;  %v782_v24 = vpop.xlane.xlu1 %781  ;;  %v940_v9 = vadd.f32 1e-05, %v919_v15  ;;  %v1720_v23 = vpop.eup %1719  ;;  %v998_v14 = vmul.f32 %v1718_v11, %v977_v45  ;;  %v980_v11 = vld [vmem:[%s3661_s1 + $0x28] sm:$0xff] }
 0x16e   :  { %v920_v28 = vmul.f32 0.0012755102, %v782_v24  ;;  %v999_v61 = vmul.f32 %v1720_v23, %v978_v39  ;;  %v984_v24 = vld [vmem:[%s3661_s1 + $0x48] sm:$0xff] }
 0x170   :  { %v941_v17 = vadd.f32 1e-05, %v920_v28 }
 0x174   :  { %v791_v51 = vpop.xlane.xlu0 %790 }
 0x175   :  { %v921_v25 = vmul.f32 0.0012755102, %v791_v51 }
 0x177   :  { %v942_v0 = vadd.f32 1e-05, %v921_v25  ;;  %v1722_v25 = vpop.eup %1721 }
 0x178   :  { %v1724_v15 = vpop.eup %1723 }
 0x179   :  { %1725 = vrsqrt.f32 %v942_v0  ;;  %v800_v57 = vpop.xlane.xlu1 %799  ;;  %v1001_v39 = vmul.f32 %v1724_v15, %v980_v11 }
 0x17a   :  { %1727 = vrsqrt.f32 %v939_v20  ;;  %v922_v26 = vmul.f32 0.0012755102, %v800_v57  ;;  %v1000_v20 = vmul.f32 %v1722_v25, %v979_v18  ;;  %v982_v25 = vld [vmem:[%s3661_s1 + $0x38] sm:$0xff] }
 0x17b   :  { %1729 = vrsqrt.f32 %v940_v9  ;;  %v986_v18 = vld [vmem:[%s3661_s1 + $0x58] sm:$0xff] }
 0x17c   :  { %v943_v45 = vadd.f32 1e-05, %v922_v26 }
 0x17e   :  { %1024 = vperm.xlu1 %1712, %v997_v33  }
 0x17f   :  { %v809_v50 = vpop.xlane.xlu0 %808 }
 0x180   :  { %v923_v32 = vmul.f32 0.0012755102, %v809_v50 }
 0x182   :  { %1029 = vperm.xlu1 %1712, %v998_v14   ;;  %v944_v51 = vadd.f32 1e-05, %v923_v32 }
 0x184   :  { %1731 = vrsqrt.f32 %v944_v51 }
 0x185   :  { %v818_v0 = vpop.xlane.xlu1 %817  ;;  %1733 = vrsqrt.f32 %v941_v17 }
 0x186   :  { %1034 = vperm.xlu1 %1712, %v999_v61   ;;  %v1726_v33 = vpop.eup %1725  ;;  %v924_v9 = vmul.f32 0.0012755102, %v818_v0  ;;  %1735 = vrsqrt.f32 %v943_v45  ;;  %v981_v61 = vld [vmem:[%s3661_s1 + $0x30] sm:$0xff] }
 0x187   :  { %v1005_v23 = vmul.f32 %v1726_v33, %v984_v24  ;;  %v1728_v14 = vpop.eup %1727 }
 0x188   :  { %v945_v50 = vadd.f32 1e-05, %v924_v9  ;;  %v1730_v51 = vpop.eup %1729  ;;  %v1002_v26 = vmul.f32 %v1728_v14, %v981_v61  ;;  %v983_v9 = vld [vmem:[%s3661_s1 + $0x40] sm:$0xff] }
 0x189   :  { %1064 = vperm.xlu0 %1711, %v1005_v23   ;;  %v1003_v15 = vmul.f32 %v1730_v51, %v982_v25 }
 0x18a   :  { %v827_v57 = vpop.xlane.xlu0 %826  ;;  %1039 = vperm.xlu1 %1712, %v1000_v20  }
 0x18b   :  { %v925_v28 = vmul.f32 0.0012755102, %v827_v57 }
 0x18d   :  { %v946_v32 = vadd.f32 1e-05, %v925_v28 }
 0x18e   :  { %1044 = vperm.xlu1 %1712, %v1001_v39  }
 0x18f   :  { %1737 = vrsqrt.f32 %v946_v32  ;;  %v988_v32 = vld [vmem:[%s3661_s1 + $0x68] sm:$0xff] }
 0x190   :  { %1739 = vrsqrt.f32 %v945_v50  ;;  %v836_v17 = vpop.xlane.xlu1 %835  ;;  %v985_v50 = vld [vmem:[%s3661_s1 + $0x50] sm:$0xff] }
 0x191   :  { %v926_v0 = vmul.f32 0.0012755102, %v836_v17  ;;  %v1732_v24 = vpop.eup %1731 }
 0x192   :  { %1049 = vperm.xlu1 %1712, %v1002_v26   ;;  %v1007_v20 = vmul.f32 %v1732_v24, %v986_v18  ;;  %v1734_v11 = vpop.eup %1733 }
 0x193   :  { %v947_v33 = vadd.f32 1e-05, %v926_v0  ;;  %v1004_v39 = vmul.f32 %v1734_v11, %v983_v9  ;;  %v1736_v28 = vpop.eup %1735  ;;  %v987_v0 = vld [vmem:[%s3661_s1 + $0x60] sm:$0xff] }
 0x194   :  { %1074 = vperm.xlu0 %1711, %v1007_v20   ;;  %v1006_v25 = vmul.f32 %v1736_v28, %v985_v50  ;;  %v989_v20 = vld [vmem:[%s3661_s1 + $0x70] sm:$0xff] }
 0x195   :  { %1741 = vrsqrt.f32 %v947_v33  ;;  %v845_v45 = vpop.xlane.xlu0 %844 }
 0x196   :  { %v927_v23 = vmul.f32 0.0012755102, %v845_v45  ;;  %1054 = vperm.xlu1 %1712, %v1003_v15  }
 0x198   :  { %v948_v57 = vadd.f32 1e-05, %v927_v23 }
 0x19a   :  { %1743 = vrsqrt.f32 %v948_v57  ;;  %1059 = vperm.xlu1 %1712, %v1004_v39   ;;  %v990_v57 = vld [vmem:[%s3661_s1 + $0x78] sm:$0xff] }
 0x19b   :  { %v854_v14 = vpop.xlane.xlu1 %853 }
 0x19c   :  { %v928_v61 = vmul.f32 0.0012755102, %v854_v14  ;;  %v1738_v51 = vpop.eup %1737 }
 0x19d   :  { %v1740_v17 = vpop.eup %1739  ;;  %v1009_v18 = vmul.f32 %v1738_v51, %v988_v32 }
 0x19e   :  { %v949_v26 = vadd.f32 1e-05, %v928_v61  ;;  %1069 = vperm.xlu1 %1712, %v1006_v25   ;;  %v1008_v33 = vmul.f32 %v1740_v17, %v987_v0  ;;  %v991_v61 = vld [vmem:[%s3661_s1 + $0x80] sm:$0xff] }
 0x19f   :  { %1084 = vperm.xlu0 %1711, %v1009_v18   ;;  %v992_v18 = vld [vmem:[%s3661_s1 + $0x88] sm:$0xff] }
 0x1a0   :  { %1745 = vrsqrt.f32 %v949_v26  ;;  %v863_v24 = vpop.xlane.xlu0 %862 }
 0x1a1   :  { %v929_v15 = vmul.f32 0.0012755102, %v863_v24 }
 0x1a2   :  { %v1742_v11 = vpop.eup %1741  ;;  %1079 = vperm.xlu1 %1712, %v1008_v33   ;;  %v993_v33 = vld [vmem:[%s3661_s1 + $0x90] sm:$0xff] }
 0x1a3   :  { %v950_v45 = vadd.f32 1e-05, %v929_v15  ;;  %v1010_v9 = vmul.f32 %v1742_v11, %v989_v20 }
 0x1a5   :  { %1747 = vrsqrt.f32 %v950_v45  ;;  %v872_v23 = vpop.xlane.xlu1 %871 }
 0x1a6   :  { %v930_v39 = vmul.f32 0.0012755102, %v872_v23  ;;  %1089 = vperm.xlu1 %1712, %v1010_v9   ;;  %v994_v23 = vld [vmem:[%s3661_s1 + $0x98] sm:$0xff] }
 0x1a7   :  { %v1744_v28 = vpop.eup %1743 }
 0x1a8   :  { %v951_v50 = vadd.f32 1e-05, %v930_v39  ;;  %v1011_v14 = vmul.f32 %v1744_v28, %v990_v57 }
 0x1aa   :  { %1749 = vrsqrt.f32 %v951_v50  ;;  %1094 = vperm.xlu0 %1711, %v1011_v14   ;;  %v1289_v50 = vld [vmem:[%s3662_s2 + $0xa0] sm:$0xff] }
 0x1ab   :  { %v881_v32 = vpop.xlane.xlu0 %880 }
 0x1ac   :  { %v931_v51 = vmul.f32 0.0012755102, %v881_v32 }
 0x1ad   :  { %v1746_v25 = vpop.eup %1745 }
 0x1ae   :  { %v952_v17 = vadd.f32 1e-05, %v931_v51  ;;  %v1012_v26 = vmul.f32 %v1746_v25, %v991_v61  ;;  %v3298_v61 = vpop.permute.xlu1 %1307 }
 0x1b0   :  { %1751 = vrsqrt.f32 %v952_v17  ;;  %1099 = vperm.xlu1 %1712, %v1012_v26  }
 0x1b2   :  { %v1748_v0 = vpop.eup %1747  ;;  %v3302_v25 = vpop.permute.xlu1 %1317 }
 0x1b3   :  { %v3277_v24 = vpop.permute.xlu0 %1302  ;;  %v1013_v15 = vmul.f32 %v1748_v0, %v992_v18 }
 0x1b5   :  { %1104 = vperm.xlu0 %1711, %v1013_v15  }
 0x1b6   :  { %v3308_v18 = vpop.permute.xlu1 %1327 }
 0x1b7   :  { %v3282_v20 = vpop.permute.xlu0 %1312  ;;  %v1750_v11 = vpop.eup %1749 }
 0x1b8   :  { %v1014_v45 = vmul.f32 %v1750_v11, %v993_v33 }
 0x1ba   :  { %1109 = vperm.xlu1 %1712, %v1014_v45  }
 0x1bb   :  { %v3284_v9 = vpop.permute.xlu0 %1322 }
 0x1bd   :  { %v1752_v57 = vpop.eup %1751 }
 0x1be   :  { %v1015_v39 = vmul.f32 %v1752_v57, %v994_v23 }
 0x1bf   :  { %v3289_v28 = vpop.permute.xlu0 %1332 }
 0x1c0   :  { %1114 = vperm.xlu0 %1711, %v1015_v39  }
 0x1c3   :  { %v3294_v14 = vpop.permute.xlu0 %1342 }
 0x1c4   :  { %1392 = vperm.xlu0 %1711, %v1289_v50  }
 0x1c7   :  { %v3296_v32 = vpop.permute.xlu0 %1352 }
 0x1cb   :  { %v3300_v51 = vpop.permute.xlu0 %1362 }
 0x1cf   :  { %v3304_v17 = vpop.permute.xlu0 %1372 }
 0x1d3   :  { %v3306_v26 = vpop.permute.xlu0 %1382 }
 0x1d4   :  { %4172 = vst [vmem:[#allocation116_spill] sm:$0xff] %v3306_v26  ;;  %v3321_v26 = vpop.permute.xlu1 %1337 }
 0x1d7   :  { %v1020_v0 = vpop.permute.xlu0 %1019 }
 0x1d8   :  { %v1122_v15 = vmul.f32 %v1020_v0, %v2291_v34  ;;  %v1123_v33 = vmul.f32 %v1020_v0, %v2294_v58  ;;  %v1124_v11 = vmul.f32 %v1020_v0, %v2297_v63  ;;  %v1125_v45 = vmul.f32 %v1020_v0, %v2303_v4 }
 0x1d9   :  { %v1126_v23 = vmul.f32 %v1020_v0, %v2315_v10  ;;  %v1127_v57 = vmul.f32 %v1020_v0, %v2324_v5  ;;  %v1128_v39 = vmul.f32 %v1020_v0, %v2306_v1  ;;  %v3327_v1 = vpop.permute.xlu1 %1347 }
 0x1da   :  { %v1395_v50 = vadd.f32 %v3209_v19, %v1122_v15  ;;  %v1396_v44 = vadd.f32 %v3209_v19, %v1123_v33  ;;  %v1397_v55 = vadd.f32 %v3209_v19, %v1124_v11  ;;  %v1398_v34 = vadd.f32 %v3209_v19, %v1125_v45 }
 0x1db   :  { %v1399_v58 = vadd.f32 %v3209_v19, %v1126_v23  ;;  %v1400_v63 = vadd.f32 %v3209_v19, %v1127_v57  ;;  %v1401_v4 = vadd.f32 %v3209_v19, %v1128_v39 }
 0x1dc   :  { %1542 = vst [vmem:[#allocation5] sm:$0xff] %v1395_v50  ;;  %1543 = vst [vmem:[#allocation5 + $0x8] sm:$0xff] %v1396_v44 }
 0x1dd   :  { %1544 = vst [vmem:[#allocation5 + $0x10] sm:$0xff] %v1397_v55  ;;  %1545 = vst [vmem:[#allocation5 + $0x18] sm:$0xff] %v1398_v34  ;;  %v3329_v10 = vpop.permute.xlu1 %1357 }
 0x1de   :  { %1546 = vst [vmem:[#allocation5 + $0x20] sm:$0xff] %v1399_v58  ;;  %1547 = vst [vmem:[#allocation5 + $0x28] sm:$0xff] %v1400_v63 }
 0x1df   :  { %1548 = vst.msk [vmem:[#allocation5 + $0x30] sm:$0xff] %vm181_vm0, %v1401_v4 }
 0x1e1   :  { %v3331_v5 = vpop.permute.xlu1 %1367 }
 0x1e5   :  { %v3333_v0 = vpop.permute.xlu1 %1377 }
 0x1f6   :  { %v890_v15 = vpop.xlane.xlu1 %889 }
 0x1f7   :  { %v932_v33 = vmul.f32 0.0012755102, %v890_v15 }
 0x1f9   :  { %v953_v11 = vadd.f32 1e-05, %v932_v33  ;;  %v4174_v33 = vld [vmem:[#allocation106_spill] sm:$0xff] }
 0x1fa   :  { %v1025_v19 = vpop.permute.xlu1 %1024 }
 0x1fb   :  { %1753 = vrsqrt.f32 %v953_v11  ;;  %v1129_v55 = vmul.f32 %v1025_v19, %v2353_v7  ;;  %v1130_v44 = vmul.f32 %v1025_v19, %v2356_v3  ;;  %v1131_v45 = vmul.f32 %v1025_v19, %v2361_v21 }
 0x1fc   :  { %v1132_v23 = vmul.f32 %v1025_v19, %v2377_v52  ;;  %v1133_v57 = vmul.f32 %v1025_v19, %v2380_v8  ;;  %v1134_v39 = vmul.f32 %v1025_v19, %v2383_v12  ;;  %v1135_v50 = vmul.f32 %v1025_v19, %v2370_v30  ;;  %v4173_v12 = vld [vmem:[#allocation105_spill] sm:$0xff]  ;;  %v4175_v19 = vld [vmem:[#allocation108_spill] sm:$0xff] }
 0x1fd   :  { %v1402_v34 = vadd.f32 %v3169_v47, %v1129_v55  ;;  %v1403_v58 = vadd.f32 %v3169_v47, %v1130_v44  ;;  %v1404_v63 = vadd.f32 %v3169_v47, %v1131_v45  ;;  %v4176_v44 = vld [vmem:[#allocation107_spill] sm:$0xff] }
 0x1fe   :  { %v1405_v7 = vadd.f32 %v3169_v47, %v1132_v23  ;;  %v1406_v3 = vadd.f32 %v3169_v47, %v1133_v57  ;;  %v1407_v21 = vadd.f32 %v3169_v47, %v1134_v39  ;;  %v1408_v52 = vadd.f32 %v3169_v47, %v1135_v50  ;;  %v1030_v4 = vpop.permute.xlu1 %1029 }
 0x1ff   :  { %1549 = vst [vmem:[#allocation5 + $0x38] sm:$0xff] %v1402_v34  ;;  %1550 = vst [vmem:[#allocation5 + $0x40] sm:$0xff] %v1403_v58  ;;  %v1136_v30 = vmul.f32 %v1030_v4, %v2285_v42  ;;  %v1137_v8 = vmul.f32 %v1030_v4, %v2288_v40  ;;  %v1138_v15 = vmul.f32 %v1030_v4, %v4173_v12 }
 0x200   :  { %1551 = vst [vmem:[#allocation5 + $0x48] sm:$0xff] %v1404_v63  ;;  %v1139_v11 = vmul.f32 %v1030_v4, %v4174_v33  ;;  %1552 = vst [vmem:[#allocation5 + $0x50] sm:$0xff] %v1405_v7  ;;  %v1140_v55 = vmul.f32 %v1030_v4, %v4175_v19  ;;  %v1141_v47 = vmul.f32 %v1030_v4, %v2330_v62  ;;  %v4177_v62 = vld [vmem:[#allocation109_spill] sm:$0xff] }
 0x201   :  { %1553 = vst [vmem:[#allocation5 + $0x58] sm:$0xff] %v1406_v3  ;;  %1554 = vst [vmem:[#allocation5 + $0x60] sm:$0xff] %v1407_v21  ;;  %v1142_v45 = vmul.f32 %v1030_v4, %v4176_v44  ;;  %v1409_v23 = vadd.f32 %v3277_v24, %v1136_v30  ;;  %v1410_v42 = vadd.f32 %v3277_v24, %v1137_v8 }
 0x202   :  { %1555 = vst.msk [vmem:[#allocation5 + $0x68] sm:$0xff] %vm181_vm0, %v1408_v52  ;;  %v1411_v40 = vadd.f32 %v3277_v24, %v1138_v15  ;;  %v1412_v57 = vadd.f32 %v3277_v24, %v1139_v11  ;;  %v1413_v39 = vadd.f32 %v3277_v24, %v1140_v55  ;;  %v1414_v50 = vadd.f32 %v3277_v24, %v1141_v47  ;;  %v1035_v58 = vpop.permute.xlu1 %1034  ;;  %v4178_v47 = vld [vmem:[#allocation111_spill] sm:$0xff] }
 0x203   :  { %v1415_v34 = vadd.f32 %v3277_v24, %v1142_v45  ;;  %1556 = vst [vmem:[#allocation5 + $0x70] sm:$0xff] %v1409_v23  ;;  %1557 = vst [vmem:[#allocation5 + $0x78] sm:$0xff] %v1410_v42  ;;  %v1143_v63 = vmul.f32 %v1035_v58, %v4177_v62  ;;  %v1144_v7 = vmul.f32 %v1035_v58, %v2393_v22 }
 0x204   :  { %1558 = vst [vmem:[#allocation5 + $0x80] sm:$0xff] %v1411_v40  ;;  %1559 = vst [vmem:[#allocation5 + $0x88] sm:$0xff] %v1412_v57  ;;  %v1145_v3 = vmul.f32 %v1035_v58, %v2396_v31  ;;  %v1146_v21 = vmul.f32 %v1035_v58, %v2401_v59  ;;  %v1147_v52 = vmul.f32 %v1035_v58, %v2410_v2  ;;  %v3376_v12 = vpop.permute.xlu0 %1064  ;;  %v995_v59 = vld [vmem:[%s3661_s1 + $0xa0] sm:$0xff] }
 0x205   :  { %1560 = vst [vmem:[#allocation5 + $0x90] sm:$0xff] %v1413_v39  ;;  %1561 = vst [vmem:[#allocation5 + $0x98] sm:$0xff] %v1414_v50  ;;  %v1148_v24 = vmul.f32 %v1035_v58, %v2422_v35  ;;  %v1149_v4 = vmul.f32 %v1035_v58, %v2413_v16  ;;  %v1416_v30 = vadd.f32 %v3298_v61, %v1143_v63  ;;  %v4181_v40 = vld [vmem:[#allocation110_spill] sm:$0xff] }
 0x206   :  { %1562 = vst.msk [vmem:[#allocation5 + $0xa0] sm:$0xff] %vm181_vm0, %v1415_v34  ;;  %v1417_v8 = vadd.f32 %v3298_v61, %v1144_v7  ;;  %v1418_v22 = vadd.f32 %v3298_v61, %v1145_v3  ;;  %v1419_v31 = vadd.f32 %v3298_v61, %v1146_v21  ;;  %v1420_v2 = vadd.f32 %v3298_v61, %v1147_v52  ;;  %v1040_v15 = vpop.permute.xlu1 %1039  ;;  %v4183_v21 = vld [vmem:[#allocation115_spill] sm:$0xff] }
 0x207   :  { %v1421_v35 = vadd.f32 %v3298_v61, %v1148_v24  ;;  %v1422_v16 = vadd.f32 %v3298_v61, %v1149_v4  ;;  %v1185_v33 = vmul.f32 %v3376_v12, %v2664_v36  ;;  %1563 = vst [vmem:[#allocation5 + $0xa8] sm:$0xff] %v1416_v30  ;;  %v1150_v11 = vmul.f32 %v1040_v15, %v2433_v48  ;;  %v4179_v61 = vld [vmem:[#allocation112_spill] sm:$0xff]  ;;  %v4180_v36 = vld [vmem:[#allocation113_spill] sm:$0xff] }
 0x208   :  { %1564 = vst [vmem:[#allocation5 + $0xb0] sm:$0xff] %v1417_v8  ;;  %1565 = vst [vmem:[#allocation5 + $0xb8] sm:$0xff] %v1418_v22  ;;  %v1151_v19 = vmul.f32 %v1040_v15, %v2437_v49  ;;  %v1152_v55 = vmul.f32 %v1040_v15, %v2445_v6  ;;  %v1153_v44 = vmul.f32 %v1040_v15, %v4178_v47  ;;  %v1754_v45 = vpop.eup %1753  ;;  %v4184_v24 = vld [vmem:[#allocation8_spill] sm:$0xff]  ;;  %v4185_v30 = vld [vmem:[#allocation9_spill] sm:$0xff] }
 0x209   :  { %1566 = vst [vmem:[#allocation5 + $0xc0] sm:$0xff] %v1419_v31  ;;  %1567 = vst [vmem:[#allocation5 + $0xc8] sm:$0xff] %v1420_v2  ;;  %v1154_v23 = vmul.f32 %v1040_v15, %v4179_v61  ;;  %v1155_v42 = vmul.f32 %v1040_v15, %v4180_v36  ;;  %v1156_v57 = vmul.f32 %v1040_v15, %v4181_v40  ;;  %v1288_v22 = vld [vmem:[%s3662_s2 + $0x98] sm:$0xff]  ;;  %v4189_v15 = vld [vmem:[#allocation30_spill] sm:$0xff]  ;;  %s1810_s2 = smov [#allocation5]  }
 0x20a   :  { %1568 = vst [vmem:[#allocation5 + $0xd0] sm:$0xff] %v1421_v35  ;;  %1569 = vst.msk [vmem:[#allocation5 + $0xd8] sm:$0xff] %vm181_vm0, %v1422_v16  ;;  %v1186_v48 = vmul.f32 %v3376_v12, %v2670_v56  ;;  %v1016_v39 = vmul.f32 %v1754_v45, %v995_v59  ;;  %v1423_v49 = vadd.f32 %v3282_v20, %v1150_v11  ;;  %v1045_v7 = vpop.permute.xlu1 %1044  ;;  %v4182_v56 = vld [vmem:[#allocation114_spill] sm:$0xff]  ;;  %v4190_v36 = vld [vmem:[#allocation31_spill] sm:$0xff]  ;;  %s1694_s23 = sshll.u32 %s1810_s2, 4  ;;  %s1695_s23 = int_to_ptr.vmem [resolvable:$true] %s1694_s23 }
 0x20b   :  { %v1424_v6 = vadd.f32 %v3282_v20, %v1151_v19  ;;  %v1425_v50 = vadd.f32 %v3282_v20, %v1152_v55  ;;  %v1426_v34 = vadd.f32 %v3282_v20, %v1153_v44  ;;  %v1427_v58 = vadd.f32 %v3282_v20, %v1154_v23  ;;  %v4187_v59 = vld [vmem:[#allocation14_spill] sm:$0xff]  ;;  %s1782_s24 = scalar_lea.vmem %s1695_s23, 18816  ;;  %p1787_p6 = scmp.lt.s32.totalorder %s1695_s23, %s1695_s23 }
 0x20c   :  { %v1428_v62 = vadd.f32 %v3282_v20, %v1155_v42  ;;  %v1429_v63 = vadd.f32 %v3282_v20, %v1156_v57  ;;  %1119 = vperm.xlu1 %1712, %v1016_v39   ;;  %1570 = vst [vmem:[#allocation5 + $0xe0] sm:$0xff] %v1423_v49  ;;  %v1157_v3 = vmul.f32 %v1045_v7, %v4182_v56  ;;  %v4186_v20 = vld [vmem:[#allocation13_spill] sm:$0xff]  ;;  %v4188_v35 = vld [vmem:[#allocation18_spill] sm:$0xff]  ;;  %v4191_v57 = vld [vmem:[#allocation32_spill] sm:$0xff]  ;;  %p1783_p5 = scmp.ne.s32.totalorder %s1695_s23, %s1782_s24  ;;  %p1788_p7 = scmp.lt.s32.totalorder %s1782_s24, %s1782_s24 }
 0x20d   :  { %1571 = vst [vmem:[#allocation5 + $0xe8] sm:$0xff] %v1424_v6  ;;  %1572 = vst [vmem:[#allocation5 + $0xf0] sm:$0xff] %v1425_v50  ;;  %v1158_v52 = vmul.f32 %v1045_v7, %v4183_v21  ;;  %v1159_v4 = vmul.f32 %v1045_v7, %v4184_v24  ;;  %v1160_v8 = vmul.f32 %v1045_v7, %v4185_v30  ;;  %v4192_v49 = vld [vmem:[#allocation40_spill] sm:$0xff]  ;;  %v4197_v30 = vld [vmem:[#allocation15_spill] sm:$0xff] }
 0x20e   :  { %1573 = vst [vmem:[#allocation5 + $0xf8] sm:$0xff] %v1426_v34  ;;  %1574 = vst [vmem:[#allocation5 + $0x100] sm:$0xff] %v1427_v58  ;;  %v1161_v31 = vmul.f32 %v1045_v7, %v4186_v20  ;;  %v1162_v2 = vmul.f32 %v1045_v7, %v4187_v59  ;;  %v1163_v16 = vmul.f32 %v1045_v7, %v4188_v35  ;;  %v1050_v40 = vpop.permute.xlu1 %1049  ;;  %v4193_v50 = vld [vmem:[#allocation36_spill] sm:$0xff]  ;;  %v4194_v7 = vld [vmem:[#allocation10_spill] sm:$0xff]  ;;  %p1789_p8 = por %p1788_p7, %p1787_p6 }
 0x20f   :  { %1575 = vst [vmem:[#allocation5 + $0x108] sm:$0xff] %v1428_v62  ;;  %1576 = vst.msk [vmem:[#allocation5 + $0x110] sm:$0xff] %vm181_vm0, %v1429_v63  ;;  %v1187_v11 = vmul.f32 %v3376_v12, %v4189_v15  ;;  %v1430_v19 = vadd.f32 %v3302_v25, %v1157_v3  ;;  %v1431_v55 = vadd.f32 %v3302_v25, %v1158_v52  ;;  %v1075_v3 = vpop.permute.xlu0 %1074 }
 0x210   :  { %v1432_v47 = vadd.f32 %v3302_v25, %v1159_v4  ;;  %v1433_v44 = vadd.f32 %v3302_v25, %v1160_v8  ;;  %v1434_v45 = vadd.f32 %v3302_v25, %v1161_v31  ;;  %v1435_v61 = vadd.f32 %v3302_v25, %v1162_v2  ;;  %1387 = vperm.xlu1 %1712, %v1288_v22   ;;  %v4198_v22 = vld [vmem:[#allocation19_spill] sm:$0xff]  ;;  %v4199_v31 = vld [vmem:[#allocation21_spill] sm:$0xff]  ;;  %p1790_p9 = pnand %p1789_p8, %p1783_p5 }
 0x211   :  { %v1436_v23 = vadd.f32 %v3302_v25, %v1163_v16  ;;  %v1188_v42 = vmul.f32 %v3376_v12, %v4190_v36  ;;  %1577 = vst [vmem:[#allocation5 + $0x118] sm:$0xff] %v1430_v19  ;;  %1578 = vst [vmem:[#allocation5 + $0x120] sm:$0xff] %v1431_v55  ;;  %v1189_v39 = vmul.f32 %v3376_v12, %v4191_v57  ;;  %v4204_v57 = vld [vmem:[#allocation46_spill] sm:$0xff] }
 0x212   :  { %1579 = vst [vmem:[#allocation5 + $0x128] sm:$0xff] %v1432_v47  ;;  %1580 = vst [vmem:[#allocation5 + $0x130] sm:$0xff] %v1433_v44  ;;  %v1190_v6 = vmul.f32 %v3376_v12, %v4192_v49  ;;  %v1191_v34 = vmul.f32 %v3376_v12, %v4193_v50  ;;  %v1458_v25 = vadd.f32 %v3321_v26, %v1185_v33  ;;  %v4195_v33 = vld [vmem:[#allocation11_spill] sm:$0xff]  ;;  %v1055_v2 = vpop.permute.xlu1 %1054  ;;  %v4206_v50 = vld [vmem:[#allocation50_spill] sm:$0xff] }
 0x213   :  { %1581 = vst [vmem:[#allocation5 + $0x138] sm:$0xff] %v1434_v45  ;;  %1582 = vst [vmem:[#allocation5 + $0x140] sm:$0xff] %v1435_v61  ;;  %v1459_v58 = vadd.f32 %v3321_v26, %v1186_v48  ;;  %v1460_v62 = vadd.f32 %v3321_v26, %v1187_v11  ;;  %v1461_v63 = vadd.f32 %v3321_v26, %v1188_v42  ;;  %v4196_v48 = vld [vmem:[#allocation12_spill] sm:$0xff]  ;;  %v4201_v11 = vld [vmem:[#allocation49_spill] sm:$0xff] }
 0x214   :  { %1583 = vst.msk [vmem:[#allocation5 + $0x148] sm:$0xff] %vm181_vm0, %v1436_v23  ;;  %v1164_v56 = vmul.f32 %v1050_v40, %v4194_v7  ;;  %v1462_v21 = vadd.f32 %v3321_v26, %v1189_v39  ;;  %v1463_v52 = vadd.f32 %v3321_v26, %v1190_v6  ;;  %v1464_v12 = vadd.f32 %v3321_v26, %v1191_v34  ;;  %v4200_v26 = vld [vmem:[#allocation24_spill] sm:$0xff]  ;;  %v4202_v23 = vld [vmem:[#allocation54_spill] sm:$0xff]  ;;  %v4205_v49 = vld [vmem:[#allocation47_spill] sm:$0xff] }
 0x215   :  { %1605 = vst [vmem:[#allocation5 + $0x1f8] sm:$0xff] %v1458_v25  ;;  %v1165_v24 = vmul.f32 %v1050_v40, %v4195_v33  ;;  %1606 = vst [vmem:[#allocation5 + $0x200] sm:$0xff] %v1459_v58  ;;  %v1166_v4 = vmul.f32 %v1050_v40, %v4196_v48  ;;  %v1167_v8 = vmul.f32 %v1050_v40, %v4197_v30  ;;  %v4203_v42 = vld [vmem:[#allocation44_spill] sm:$0xff]  ;;  %v4207_v25 = vld [vmem:[#allocation55_spill] sm:$0xff] }
 0x216   :  { %1607 = vst [vmem:[#allocation5 + $0x208] sm:$0xff] %v1460_v62  ;;  %1608 = vst [vmem:[#allocation5 + $0x210] sm:$0xff] %v1461_v63  ;;  %v1168_v20 = vmul.f32 %v1050_v40, %v4198_v22  ;;  %v1169_v59 = vmul.f32 %v1050_v40, %v4199_v31  ;;  %v1170_v35 = vmul.f32 %v1050_v40, %v4200_v26  ;;  %v3462_v62 = vpop.permute.xlu1 %1059 }
 0x217   :  { %1609 = vst [vmem:[#allocation5 + $0x218] sm:$0xff] %v1462_v21  ;;  %1610 = vst [vmem:[#allocation5 + $0x220] sm:$0xff] %v1463_v52  ;;  %v1437_v16 = vadd.f32 %v3284_v9, %v1164_v56  ;;  %v1438_v15 = vadd.f32 %v3284_v9, %v1165_v24  ;;  %v1199_v19 = vmul.f32 %v1075_v3, %v4201_v11  ;;  %v4208_v21 = vld [vmem:[#allocation16_spill] sm:$0xff]  ;;  %v4209_v24 = vld [vmem:[#allocation17_spill] sm:$0xff] }
 0x218   :  { %1611 = vst.msk [vmem:[#allocation5 + $0x228] sm:$0xff] %vm181_vm0, %v1464_v12  ;;  %v1439_v55 = vadd.f32 %v3284_v9, %v1166_v4  ;;  %v1440_v47 = vadd.f32 %v3284_v9, %v1167_v8  ;;  %v1441_v44 = vadd.f32 %v3284_v9, %v1168_v20  ;;  %v1442_v45 = vadd.f32 %v3284_v9, %v1169_v59  ;;  %v4210_v4 = vld [vmem:[#allocation20_spill] sm:$0xff]  ;;  %v4211_v8 = vld [vmem:[#allocation22_spill] sm:$0xff]  ;;  %v4212_v20 = vld [vmem:[#allocation27_spill] sm:$0xff] }
 0x219   :  { %v1443_v61 = vadd.f32 %v3284_v9, %v1170_v35  ;;  %1584 = vst [vmem:[#allocation5 + $0x150] sm:$0xff] %v1437_v16  ;;  %1585 = vst [vmem:[#allocation5 + $0x158] sm:$0xff] %v1438_v15  ;;  %v1200_v36 = vmul.f32 %v1075_v3, %v4202_v23  ;;  %v1201_v40 = vmul.f32 %v1075_v3, %v4203_v42  ;;  %v4213_v59 = vld [vmem:[#allocation33_spill] sm:$0xff]  ;;  %v4214_v35 = vld [vmem:[#allocation28_spill] sm:$0xff] }
 0x21a   :  { %v1202_v39 = vmul.f32 %v1075_v3, %v4204_v57  ;;  %1586 = vst [vmem:[#allocation5 + $0x160] sm:$0xff] %v1439_v55  ;;  %1587 = vst [vmem:[#allocation5 + $0x168] sm:$0xff] %v1440_v47  ;;  %v1203_v6 = vmul.f32 %v1075_v3, %v4205_v49  ;;  %v1204_v34 = vmul.f32 %v1075_v3, %v4206_v50  ;;  %v1085_v11 = vpop.permute.xlu0 %1084  ;;  %v1070_v47 = vpop.permute.xlu1 %1069  ;;  %v4218_v49 = vld [vmem:[#allocation58_spill] sm:$0xff]  ;;  %v4219_v50 = vld [vmem:[#allocation59_spill] sm:$0xff] }
 0x21b   :  { %1588 = vst [vmem:[#allocation5 + $0x170] sm:$0xff] %v1441_v44  ;;  %1589 = vst [vmem:[#allocation5 + $0x178] sm:$0xff] %v1442_v45  ;;  %v1205_v58 = vmul.f32 %v1075_v3, %v4207_v25  ;;  %v1472_v9 = vadd.f32 %v3327_v1, %v1199_v19  ;;  %v1473_v63 = vadd.f32 %v3327_v1, %v1200_v36  ;;  %v4215_v19 = vld [vmem:[#allocation23_spill] sm:$0xff]  ;;  %v4220_v25 = vld [vmem:[#allocation64_spill] sm:$0xff] }
 0x21c   :  { %1590 = vst.msk [vmem:[#allocation5 + $0x180] sm:$0xff] %vm181_vm0, %v1443_v61  ;;  %v1474_v7 = vadd.f32 %v3327_v1, %v1201_v40  ;;  %v1475_v56 = vadd.f32 %v3327_v1, %v1202_v39  ;;  %v1171_v52 = vmul.f32 %v1055_v2, %v4208_v21  ;;  %v1476_v12 = vadd.f32 %v3327_v1, %v1203_v6  ;;  %v4217_v40 = vld [vmem:[#allocation63_spill] sm:$0xff] }
 0x21d   :  { %v1477_v33 = vadd.f32 %v3327_v1, %v1204_v34  ;;  %v1478_v3 = vadd.f32 %v3327_v1, %v1205_v58  ;;  %1619 = vst [vmem:[#allocation5 + $0x268] sm:$0xff] %v1472_v9  ;;  %v1172_v48 = vmul.f32 %v1055_v2, %v4209_v24  ;;  %1620 = vst [vmem:[#allocation5 + $0x270] sm:$0xff] %v1473_v63  ;;  %v4221_v9 = vld [vmem:[#allocation62_spill] sm:$0xff] }
 0x21e   :  { %1621 = vst [vmem:[#allocation5 + $0x278] sm:$0xff] %v1474_v7  ;;  %1622 = vst [vmem:[#allocation5 + $0x280] sm:$0xff] %v1475_v56  ;;  %v1173_v30 = vmul.f32 %v1055_v2, %v4210_v4  ;;  %v1174_v22 = vmul.f32 %v1055_v2, %v4211_v8  ;;  %v1175_v31 = vmul.f32 %v1055_v2, %v4212_v20  ;;  %v4222_v56 = vld [vmem:[#allocation25_spill] sm:$0xff]  ;;  %v4223_v24 = vld [vmem:[#allocation26_spill] sm:$0xff] }
 0x21f   :  { %v1176_v26 = vmul.f32 %v1055_v2, %v4213_v59  ;;  %1623 = vst [vmem:[#allocation5 + $0x288] sm:$0xff] %v1476_v12  ;;  %1624 = vst [vmem:[#allocation5 + $0x290] sm:$0xff] %v1477_v33  ;;  %v1177_v1 = vmul.f32 %v1055_v2, %v4214_v35  ;;  %v1444_v16 = vadd.f32 %v3308_v18, %v1171_v52  ;;  %v4216_v2 = vld [vmem:[#allocation66_spill] sm:$0xff]  ;;  %v4224_v4 = vld [vmem:[#allocation29_spill] sm:$0xff]  ;;  %v3513_v59 = vpop.permute.xlu1 %1079 }
 0x220   :  { %1625 = vst.msk [vmem:[#allocation5 + $0x298] sm:$0xff] %vm181_vm0, %v1478_v3  ;;  %v1445_v15 = vadd.f32 %v3308_v18, %v1172_v48  ;;  %v1178_v55 = vmul.f32 %v3462_v62, %v4215_v19  ;;  %v1446_v44 = vadd.f32 %v3308_v18, %v1173_v30  ;;  %v1447_v45 = vadd.f32 %v3308_v18, %v1174_v22  ;;  %v4225_v8 = vld [vmem:[#allocation34_spill] sm:$0xff]  ;;  %v4226_v20 = vld [vmem:[#allocation35_spill] sm:$0xff] }
 0x221   :  { %v1448_v61 = vadd.f32 %v3308_v18, %v1175_v31  ;;  %v1449_v23 = vadd.f32 %v3308_v18, %v1176_v26  ;;  %v1450_v36 = vadd.f32 %v3308_v18, %v1177_v1  ;;  %1591 = vst [vmem:[#allocation5 + $0x188] sm:$0xff] %v1444_v16  ;;  %v1213_v42 = vmul.f32 %v1085_v11, %v4216_v2  ;;  %v4228_v16 = vld [vmem:[#allocation45_spill] sm:$0xff]  ;;  %v4231_v2 = vld [vmem:[#allocation38_spill] sm:$0xff] }
 0x222   :  { %1592 = vst [vmem:[#allocation5 + $0x190] sm:$0xff] %v1445_v15  ;;  %v1214_v57 = vmul.f32 %v1085_v11, %v4217_v40  ;;  %v1215_v39 = vmul.f32 %v1085_v11, %v2846_v53  ;;  %1593 = vst [vmem:[#allocation5 + $0x198] sm:$0xff] %v1446_v44  ;;  %v1216_v6 = vmul.f32 %v1085_v11, %v4218_v49  ;;  %v4232_v40 = vld [vmem:[#allocation41_spill] sm:$0xff] }
 0x223   :  { %1594 = vst [vmem:[#allocation5 + $0x1a0] sm:$0xff] %v1447_v45  ;;  %1595 = vst [vmem:[#allocation5 + $0x1a8] sm:$0xff] %v1448_v61  ;;  %v1217_v34 = vmul.f32 %v1085_v11, %v4219_v50  ;;  %v1218_v58 = vmul.f32 %v1085_v11, %v4220_v25  ;;  %v1219_v18 = vmul.f32 %v1085_v11, %v4221_v9 }
 0x224   :  { %1596 = vst [vmem:[#allocation5 + $0x1b0] sm:$0xff] %v1449_v23  ;;  %1597 = vst.msk [vmem:[#allocation5 + $0x1b8] sm:$0xff] %vm181_vm0, %v1450_v36  ;;  %v1486_v63 = vadd.f32 %v3329_v10, %v1213_v42  ;;  %v1487_v7 = vadd.f32 %v3329_v10, %v1214_v57  ;;  %v1488_v53 = vadd.f32 %v3329_v10, %v1215_v39  ;;  %v4229_v23 = vld [vmem:[#allocation42_spill] sm:$0xff]  ;;  %v4230_v36 = vld [vmem:[#allocation37_spill] sm:$0xff] }
 0x225   :  { %v1179_v21 = vmul.f32 %v3462_v62, %v4222_v56  ;;  %v1489_v52 = vadd.f32 %v3329_v10, %v1216_v6  ;;  %v1490_v12 = vadd.f32 %v3329_v10, %v1217_v34  ;;  %v1491_v33 = vadd.f32 %v3329_v10, %v1218_v58  ;;  %v4233_v39 = vld [vmem:[#allocation48_spill] sm:$0xff]  ;;  %v4234_v6 = vld [vmem:[#allocation43_spill] sm:$0xff]  ;;  %v1095_v34 = vpop.permute.xlu0 %1094 }
 0x226   :  { %v1492_v3 = vadd.f32 %v3329_v10, %v1219_v18  ;;  %1633 = vst [vmem:[#allocation5 + $0x2d8] sm:$0xff] %v1486_v63  ;;  %1634 = vst [vmem:[#allocation5 + $0x2e0] sm:$0xff] %v1487_v7  ;;  %v1180_v48 = vmul.f32 %v3462_v62, %v4223_v24  ;;  %v1181_v30 = vmul.f32 %v3462_v62, %v4224_v4  ;;  %v4227_v10 = vld [vmem:[#allocation39_spill] sm:$0xff]  ;;  %v4235_v18 = vld [vmem:[#allocation56_spill] sm:$0xff] }
 0x227   :  { %1635 = vst [vmem:[#allocation5 + $0x2e8] sm:$0xff] %v1488_v53  ;;  %v1182_v22 = vmul.f32 %v3462_v62, %v4225_v8  ;;  %v1183_v31 = vmul.f32 %v3462_v62, %v4226_v20  ;;  %1636 = vst [vmem:[#allocation5 + $0x2f0] sm:$0xff] %v1489_v52  ;;  %v1184_v26 = vmul.f32 %v3462_v62, %v4227_v10  ;;  %v4236_v53 = vld [vmem:[#allocation76_spill] sm:$0xff]  ;;  %v4239_v24 = vld [vmem:[#allocation73_spill] sm:$0xff] }
 0x228   :  { %1637 = vst [vmem:[#allocation5 + $0x2f8] sm:$0xff] %v1490_v12  ;;  %1638 = vst [vmem:[#allocation5 + $0x300] sm:$0xff] %v1491_v33  ;;  %v1451_v35 = vadd.f32 %v3289_v28, %v1178_v55  ;;  %v1452_v1 = vadd.f32 %v3289_v28, %v1179_v21  ;;  %v1192_v15 = vmul.f32 %v1070_v47, %v4228_v16  ;;  %v4237_v21 = vld [vmem:[#allocation81_spill] sm:$0xff]  ;;  %v1090_v12 = vpop.permute.xlu1 %1089  ;;  %v4238_v33 = vld [vmem:[#allocation72_spill] sm:$0xff] }
 0x229   :  { %1639 = vst.msk [vmem:[#allocation5 + $0x308] sm:$0xff] %vm181_vm0, %v1492_v3  ;;  %v1453_v11 = vadd.f32 %v3289_v28, %v1180_v48  ;;  %v1454_v19 = vadd.f32 %v3289_v28, %v1181_v30  ;;  %v1455_v44 = vadd.f32 %v3289_v28, %v1182_v22  ;;  %v1456_v45 = vadd.f32 %v3289_v28, %v1183_v31  ;;  %v4240_v4 = vld [vmem:[#allocation77_spill] sm:$0xff]  ;;  %v4241_v16 = vld [vmem:[#allocation60_spill] sm:$0xff] }
 0x22a   :  { %v1457_v61 = vadd.f32 %v3289_v28, %v1184_v26  ;;  %1598 = vst [vmem:[#allocation5 + $0x1c0] sm:$0xff] %v1451_v35  ;;  %1599 = vst [vmem:[#allocation5 + $0x1c8] sm:$0xff] %v1452_v1  ;;  %v1193_v62 = vmul.f32 %v1070_v47, %v4229_v23  ;;  %v1194_v55 = vmul.f32 %v1070_v47, %v4230_v36  ;;  %v4245_v23 = vld [vmem:[#allocation61_spill] sm:$0xff] }
 0x22b   :  { %v1195_v42 = vmul.f32 %v1070_v47, %v4231_v2  ;;  %1600 = vst [vmem:[#allocation5 + $0x1d0] sm:$0xff] %v1453_v11  ;;  %1601 = vst [vmem:[#allocation5 + $0x1d8] sm:$0xff] %v1454_v19  ;;  %v1196_v57 = vmul.f32 %v1070_v47, %v4232_v40  ;;  %v1197_v49 = vmul.f32 %v1070_v47, %v4233_v39  ;;  %v4242_v11 = vld [vmem:[#allocation51_spill] sm:$0xff] }
 0x22c   :  { %1602 = vst [vmem:[#allocation5 + $0x1e0] sm:$0xff] %v1455_v44  ;;  %1603 = vst [vmem:[#allocation5 + $0x1e8] sm:$0xff] %v1456_v45  ;;  %v1198_v50 = vmul.f32 %v1070_v47, %v4234_v6  ;;  %v1465_v28 = vadd.f32 %v3294_v14, %v1192_v15  ;;  %v1466_v25 = vadd.f32 %v3294_v14, %v1193_v62  ;;  %v4243_v44 = vld [vmem:[#allocation52_spill] sm:$0xff]  ;;  %v4246_v62 = vld [vmem:[#allocation57_spill] sm:$0xff] }
 0x22d   :  { %1604 = vst.msk [vmem:[#allocation5 + $0x1f0] sm:$0xff] %vm181_vm0, %v1457_v61  ;;  %v1467_v58 = vadd.f32 %v3294_v14, %v1194_v55  ;;  %v1468_v9 = vadd.f32 %v3294_v14, %v1195_v42  ;;  %v1206_v63 = vmul.f32 %v3513_v59, %v4235_v18  ;;  %v1227_v7 = vmul.f32 %v1095_v34, %v2924_v41 }
 0x22e   :  { %v1228_v56 = vmul.f32 %v1095_v34, %v4236_v53  ;;  %v1229_v47 = vmul.f32 %v1095_v34, %v4237_v21  ;;  %v1230_v52 = vmul.f32 %v1095_v34, %v2940_v27  ;;  %1612 = vst [vmem:[#allocation5 + $0x230] sm:$0xff] %v1465_v28  ;;  %v1231_v3 = vmul.f32 %v1095_v34, %v4238_v33  ;;  %v4252_v53 = vld [vmem:[#allocation71_spill] sm:$0xff] }
 0x22f   :  { %v1232_v48 = vmul.f32 %v1095_v34, %v4239_v24  ;;  %v1233_v30 = vmul.f32 %v1095_v34, %v4240_v4  ;;  %v1469_v8 = vadd.f32 %v3294_v14, %v1196_v57  ;;  %1613 = vst [vmem:[#allocation5 + $0x238] sm:$0xff] %v1466_v25  ;;  %1614 = vst [vmem:[#allocation5 + $0x240] sm:$0xff] %v1467_v58  ;;  %v4247_v57 = vld [vmem:[#allocation69_spill] sm:$0xff]  ;;  %v4249_v25 = vld [vmem:[#allocation75_spill] sm:$0xff] }
 0x230   :  { %1615 = vst [vmem:[#allocation5 + $0x248] sm:$0xff] %v1468_v9  ;;  %v1500_v41 = vadd.f32 %v3331_v5, %v1227_v7  ;;  %v1501_v22 = vadd.f32 %v3331_v5, %v1228_v56  ;;  %v1502_v20 = vadd.f32 %v3331_v5, %v1229_v47  ;;  %v1503_v27 = vadd.f32 %v3331_v5, %v1230_v52  ;;  %v4250_v9 = vld [vmem:[#allocation65_spill] sm:$0xff]  ;;  %v1105_v21 = vpop.permute.xlu0 %1104 }
 0x231   :  { %v1504_v31 = vadd.f32 %v3331_v5, %v1231_v3  ;;  %v1505_v10 = vadd.f32 %v3331_v5, %v1232_v48  ;;  %v1506_v26 = vadd.f32 %v3331_v5, %v1233_v30  ;;  %v1470_v35 = vadd.f32 %v3294_v14, %v1197_v49  ;;  %1616 = vst [vmem:[#allocation5 + $0x250] sm:$0xff] %v1469_v8  ;;  %v4244_v5 = vld [vmem:[#allocation53_spill] sm:$0xff]  ;;  %v1100_v49 = vpop.permute.xlu1 %1099  ;;  %v4254_v3 = vld [vmem:[#allocation74_spill] sm:$0xff] }
 0x232   :  { %1647 = vst [vmem:[#allocation5 + $0x348] sm:$0xff] %v1500_v41  ;;  %1648 = vst [vmem:[#allocation5 + $0x350] sm:$0xff] %v1501_v22  ;;  %v1471_v1 = vadd.f32 %v3294_v14, %v1198_v50  ;;  %v1207_v15 = vmul.f32 %v3513_v59, %v4241_v16  ;;  %v1208_v19 = vmul.f32 %v3513_v59, %v4242_v11  ;;  %v4255_v41 = vld [vmem:[#allocation83_spill] sm:$0xff] }
 0x233   :  { %1649 = vst [vmem:[#allocation5 + $0x358] sm:$0xff] %v1502_v20  ;;  %1650 = vst [vmem:[#allocation5 + $0x360] sm:$0xff] %v1503_v27  ;;  %v1209_v45 = vmul.f32 %v3513_v59, %v4243_v44  ;;  %v1210_v61 = vmul.f32 %v3513_v59, %v4244_v5  ;;  %v1211_v14 = vmul.f32 %v3513_v59, %v4245_v23  ;;  %v4256_v20 = vld [vmem:[#allocation90_spill] sm:$0xff] }
 0x234   :  { %1651 = vst [vmem:[#allocation5 + $0x368] sm:$0xff] %v1504_v31  ;;  %1652 = vst [vmem:[#allocation5 + $0x370] sm:$0xff] %v1505_v10  ;;  %v1212_v36 = vmul.f32 %v3513_v59, %v4246_v62  ;;  %v1479_v55 = vadd.f32 %v3296_v32, %v1206_v63  ;;  %v1480_v2 = vadd.f32 %v3296_v32, %v1207_v15  ;;  %v4248_v59 = vld [vmem:[#allocation70_spill] sm:$0xff]  ;;  %v4251_v63 = vld [vmem:[#allocation67_spill] sm:$0xff] }
 0x235   :  { %1653 = vst.msk [vmem:[#allocation5 + $0x378] sm:$0xff] %vm181_vm0, %v1506_v26  ;;  %1617 = vst [vmem:[#allocation5 + $0x258] sm:$0xff] %v1470_v35  ;;  %v1481_v42 = vadd.f32 %v3296_v32, %v1208_v19  ;;  %v1482_v40 = vadd.f32 %v3296_v32, %v1209_v45  ;;  %v1220_v39 = vmul.f32 %v1090_v12, %v4247_v57  ;;  %v4257_v31 = vld [vmem:[#allocation85_spill] sm:$0xff]  ;;  %v4258_v44 = vld [vmem:[#allocation78_spill] sm:$0xff] }
 0x236   :  { %1618 = vst.msk [vmem:[#allocation5 + $0x260] sm:$0xff] %vm181_vm0, %v1471_v1  ;;  %v1483_v6 = vadd.f32 %v3296_v32, %v1210_v61  ;;  %v1484_v50 = vadd.f32 %v3296_v32, %v1211_v14  ;;  %v1485_v28 = vadd.f32 %v3296_v32, %v1212_v36  ;;  %1626 = vst [vmem:[#allocation5 + $0x2a0] sm:$0xff] %v1479_v55  ;;  %v4253_v32 = vld [vmem:[#allocation68_spill] sm:$0xff]  ;;  %v4260_v61 = vld [vmem:[#allocation82_spill] sm:$0xff] }
 0x237   :  { %v1221_v34 = vmul.f32 %v1090_v12, %v4248_v59  ;;  %1627 = vst [vmem:[#allocation5 + $0x2a8] sm:$0xff] %v1480_v2  ;;  %1628 = vst [vmem:[#allocation5 + $0x2b0] sm:$0xff] %v1481_v42  ;;  %v1222_v58 = vmul.f32 %v1090_v12, %v4249_v25  ;;  %v1223_v18 = vmul.f32 %v1090_v12, %v4250_v9  ;;  %v4261_v14 = vld [vmem:[#allocation84_spill] sm:$0xff]  ;;  %v4262_v36 = vld [vmem:[#allocation79_spill] sm:$0xff]  ;;  %v1110_v2 = vpop.permute.xlu1 %1109 }
 0x238   :  { %1629 = vst [vmem:[#allocation5 + $0x2b8] sm:$0xff] %v1482_v40  ;;  %v1224_v7 = vmul.f32 %v1090_v12, %v4251_v63  ;;  %v1225_v56 = vmul.f32 %v1090_v12, %v4252_v53  ;;  %1630 = vst [vmem:[#allocation5 + $0x2c0] sm:$0xff] %v1483_v6  ;;  %v1226_v47 = vmul.f32 %v1090_v12, %v4253_v32  ;;  %v4266_v9 = vld [vmem:[#allocation88_spill] sm:$0xff] }
 0x239   :  { %1631 = vst [vmem:[#allocation5 + $0x2c8] sm:$0xff] %v1484_v50  ;;  %1632 = vst.msk [vmem:[#allocation5 + $0x2d0] sm:$0xff] %vm181_vm0, %v1485_v28  ;;  %v1493_v52 = vadd.f32 %v3300_v51, %v1220_v39  ;;  %v1494_v33 = vadd.f32 %v3300_v51, %v1221_v34  ;;  %v1234_v24 = vmul.f32 %v1100_v49, %v4254_v3  ;;  %v4264_v39 = vld [vmem:[#allocation91_spill] sm:$0xff] }
 0x23a   :  { %v1241_v48 = vmul.f32 %v1105_v21, %v3010_v46  ;;  %v1242_v4 = vmul.f32 %v1105_v21, %v3014_v43  ;;  %v1243_v30 = vmul.f32 %v1105_v21, %v3018_v13  ;;  %v1244_v8 = vmul.f32 %v1105_v21, %v3022_v29 }
 0x23b   :  { %v1245_v22 = vmul.f32 %v1105_v21, %v4255_v41  ;;  %v1246_v27 = vmul.f32 %v1105_v21, %v4256_v20  ;;  %v1247_v12 = vmul.f32 %v1105_v21, %v4257_v31  ;;  %v1495_v10 = vadd.f32 %v3300_v51, %v1222_v58  ;;  %1640 = vst [vmem:[#allocation5 + $0x310] sm:$0xff] %v1493_v52  ;;  %v4265_v58 = vld [vmem:[#allocation86_spill] sm:$0xff]  ;;  %v4267_v21 = vld [vmem:[#allocation116_spill] sm:$0xff]  ;;  %v4272_v20 = vld [vmem:[#allocation93_spill] sm:$0xff] }
 0x23c   :  { %1641 = vst [vmem:[#allocation5 + $0x318] sm:$0xff] %v1494_v33  ;;  %v1514_v26 = vadd.f32 %v3333_v0, %v1241_v48  ;;  %v1515_v46 = vadd.f32 %v3333_v0, %v1242_v4  ;;  %v1516_v43 = vadd.f32 %v3333_v0, %v1243_v30  ;;  %v1517_v13 = vadd.f32 %v3333_v0, %v1244_v8  ;;  %v4269_v48 = vld [vmem:[#allocation92_spill] sm:$0xff]  ;;  %v4273_v31 = vld [vmem:[#allocation97_spill] sm:$0xff] }
 0x23d   :  { %v1518_v29 = vadd.f32 %v3333_v0, %v1245_v22  ;;  %v1519_v35 = vadd.f32 %v3333_v0, %v1246_v27  ;;  %v1520_v1 = vadd.f32 %v3333_v0, %v1247_v12  ;;  %v1496_v16 = vadd.f32 %v3300_v51, %v1223_v18  ;;  %1642 = vst [vmem:[#allocation5 + $0x320] sm:$0xff] %v1495_v10  ;;  %v4259_v0 = vld [vmem:[#allocation87_spill] sm:$0xff]  ;;  %v4270_v30 = vld [vmem:[#allocation96_spill] sm:$0xff]  ;;  %v4274_v10 = vld [vmem:[#allocation102_spill] sm:$0xff] }
 0x23e   :  { %1661 = vst [vmem:[#allocation5 + $0x3b8] sm:$0xff] %v1514_v26  ;;  %1662 = vst [vmem:[#allocation5 + $0x3c0] sm:$0xff] %v1515_v46  ;;  %v1497_v15 = vadd.f32 %v3300_v51, %v1224_v7  ;;  %v1498_v11 = vadd.f32 %v3300_v51, %v1225_v56  ;;  %v1499_v19 = vadd.f32 %v3300_v51, %v1226_v47  ;;  %v4263_v51 = vld [vmem:[#allocation80_spill] sm:$0xff]  ;;  %v4275_v46 = vld [vmem:[#allocation98_spill] sm:$0xff] }
 0x23f   :  { %1663 = vst [vmem:[#allocation5 + $0x3c8] sm:$0xff] %v1516_v43  ;;  %1664 = vst [vmem:[#allocation5 + $0x3d0] sm:$0xff] %v1517_v13  ;;  %v1235_v45 = vmul.f32 %v1100_v49, %v4258_v44  ;;  %v1236_v5 = vmul.f32 %v1100_v49, %v4259_v0  ;;  %v1237_v23 = vmul.f32 %v1100_v49, %v4260_v61  ;;  %v4271_v41 = vld [vmem:[#allocation100_spill] sm:$0xff]  ;;  %v4276_v13 = vld [vmem:[#allocation99_spill] sm:$0xff] }
 0x240   :  { %1665 = vst [vmem:[#allocation5 + $0x3d8] sm:$0xff] %v1518_v29  ;;  %1666 = vst [vmem:[#allocation5 + $0x3e0] sm:$0xff] %v1519_v35  ;;  %v1238_v62 = vmul.f32 %v1100_v49, %v4261_v14  ;;  %v1239_v55 = vmul.f32 %v1100_v49, %v4262_v36  ;;  %v1240_v42 = vmul.f32 %v1100_v49, %v4263_v51  ;;  %v4281_v51 = vld [vmem:[#allocation94_spill] sm:$0xff] }
 0x241   :  { %1667 = vst.msk [vmem:[#allocation5 + $0x3e8] sm:$0xff] %vm181_vm0, %v1520_v1  ;;  %1643 = vst [vmem:[#allocation5 + $0x328] sm:$0xff] %v1496_v16  ;;  %v1507_v40 = vadd.f32 %v3304_v17, %v1234_v24  ;;  %v1508_v57 = vadd.f32 %v3304_v17, %v1235_v45  ;;  %v1248_v6 = vmul.f32 %v1110_v2, %v4264_v39  ;;  %v4277_v1 = vld [vmem:[#allocation104_spill] sm:$0xff]  ;;  %v4280_v45 = vld [vmem:[#allocation95_spill] sm:$0xff] }
 0x242   :  { %1644 = vst [vmem:[#allocation5 + $0x330] sm:$0xff] %v1497_v15  ;;  %1645 = vst [vmem:[#allocation5 + $0x338] sm:$0xff] %v1498_v11  ;;  %v1509_v50 = vadd.f32 %v3304_v17, %v1236_v5  ;;  %v1510_v28 = vadd.f32 %v3304_v17, %v1237_v23  ;;  %v1511_v59 = vadd.f32 %v3304_v17, %v1238_v62  ;;  %v4278_v15 = vld [vmem:[#allocation101_spill] sm:$0xff] }
 0x243   :  { %1646 = vst.msk [vmem:[#allocation5 + $0x340] sm:$0xff] %vm181_vm0, %v1499_v19  ;;  %v1512_v34 = vadd.f32 %v3304_v17, %v1239_v55  ;;  %v1513_v25 = vadd.f32 %v3304_v17, %v1240_v42  ;;  %1654 = vst [vmem:[#allocation5 + $0x380] sm:$0xff] %v1507_v40  ;;  %v1249_v49 = vmul.f32 %v1110_v2, %v4265_v58  ;;  %v4279_v19 = vld [vmem:[#allocation103_spill] sm:$0xff] }
 0x244   :  { %1655 = vst [vmem:[#allocation5 + $0x388] sm:$0xff] %v1508_v57  ;;  %v1250_v18 = vmul.f32 %v1110_v2, %v4266_v9  ;;  %v1251_v63 = vmul.f32 %v1110_v2, %v3075_v37  ;;  %1656 = vst [vmem:[#allocation5 + $0x390] sm:$0xff] %v1509_v50  ;;  %v1252_v7 = vmul.f32 %v1110_v2, %v3081_v60 }
 0x245   :  { %1657 = vst [vmem:[#allocation5 + $0x398] sm:$0xff] %v1510_v28  ;;  %1658 = vst [vmem:[#allocation5 + $0x3a0] sm:$0xff] %v1511_v59  ;;  %v1253_v53 = vmul.f32 %v1110_v2, %v3104_v38  ;;  %v1254_v56 = vmul.f32 %v1110_v2, %v3094_v54  ;;  %v1521_v17 = vadd.f32 %v4267_v21, %v1248_v6  ;;  %v1115_v54 = vpop.permute.xlu0 %1114  ;;  %v4268_v38 = vld [vmem:[#allocation89_spill] sm:$0xff] }
 0x246   :  { %1659 = vst [vmem:[#allocation5 + $0x3a8] sm:$0xff] %v1512_v34  ;;  %1660 = vst.msk [vmem:[#allocation5 + $0x3b0] sm:$0xff] %vm181_vm0, %v1513_v25  ;;  %v1522_v32 = vadd.f32 %v4267_v21, %v1249_v49  ;;  %v1523_v47 = vadd.f32 %v4267_v21, %v1250_v18  ;;  %v1524_v37 = vadd.f32 %v4267_v21, %v1251_v63 }
 0x247   :  { %v1525_v52 = vadd.f32 %v4267_v21, %v1252_v7  ;;  %v1526_v33 = vadd.f32 %v4267_v21, %v1253_v53  ;;  %v1527_v60 = vadd.f32 %v4267_v21, %v1254_v56  ;;  %1668 = vst [vmem:[#allocation5 + $0x3f0] sm:$0xff] %v1521_v17  ;;  %v1255_v3 = vmul.f32 %v1115_v54, %v4268_v38 }
 0x248   :  { %1669 = vst [vmem:[#allocation5 + $0x3f8] sm:$0xff] %v1522_v32  ;;  %1670 = vst [vmem:[#allocation5 + $0x400] sm:$0xff] %v1523_v47  ;;  %v1256_v4 = vmul.f32 %v1115_v54, %v4269_v48  ;;  %v1257_v8 = vmul.f32 %v1115_v54, %v4270_v30  ;;  %v1258_v22 = vmul.f32 %v1115_v54, %v4271_v41 }
 0x249   :  { %1671 = vst [vmem:[#allocation5 + $0x408] sm:$0xff] %v1524_v37  ;;  %1672 = vst [vmem:[#allocation5 + $0x410] sm:$0xff] %v1525_v52  ;;  %v1259_v27 = vmul.f32 %v1115_v54, %v4272_v20  ;;  %v1393_v35 = vpop.permute.xlu0 %1392  ;;  %v1260_v0 = vmul.f32 %v1115_v54, %v4280_v45  ;;  %v1261_v42 = vmul.f32 %v1115_v54, %v4281_v51 }
 0x24a   :  { %1673 = vst [vmem:[#allocation5 + $0x418] sm:$0xff] %v1526_v33  ;;  %1674 = vst.msk [vmem:[#allocation5 + $0x420] sm:$0xff] %vm181_vm0, %v1527_v60 }
 0x287   :  { %v1120_v24 = vpop.permute.xlu1 %1119 }
 0x288   :  { %v1262_v12 = vmul.f32 %v1120_v24, %v4273_v31  ;;  %v1263_v26 = vmul.f32 %v1120_v24, %v4274_v10  ;;  %v1264_v43 = vmul.f32 %v1120_v24, %v4275_v46  ;;  %v1265_v29 = vmul.f32 %v1120_v24, %v4276_v13 }
 0x289   :  { %v1266_v16 = vmul.f32 %v1120_v24, %v4277_v1  ;;  %v1267_v11 = vmul.f32 %v1120_v24, %v4278_v15  ;;  %v1268_v44 = vmul.f32 %v1120_v24, %v4279_v19 }
 0x28a   :  { %v1535_v5 = vadd.f32 %v1393_v35, %v1262_v12  ;;  %v1536_v61 = vadd.f32 %v1393_v35, %v1263_v26  ;;  %v1537_v23 = vadd.f32 %v1393_v35, %v1264_v43  ;;  %v1538_v14 = vadd.f32 %v1393_v35, %v1265_v29 }
 0x28b   :  { %v1539_v62 = vadd.f32 %v1393_v35, %v1266_v16  ;;  %v1540_v36 = vadd.f32 %v1393_v35, %v1267_v11  ;;  %v1541_v55 = vadd.f32 %v1393_v35, %v1268_v44  ;;  %v1388_v2 = vpop.permute.xlu1 %1387 }
 0x28c   :  { %1682 = vst [vmem:[#allocation5 + $0x460] sm:$0xff] %v1535_v5  ;;  %1683 = vst [vmem:[#allocation5 + $0x468] sm:$0xff] %v1536_v61  ;;  %v1528_v40 = vadd.f32 %v1388_v2, %v1255_v3  ;;  %v1529_v57 = vadd.f32 %v1388_v2, %v1256_v4  ;;  %v1530_v39 = vadd.f32 %v1388_v2, %v1257_v8 }
 0x28d   :  { %1684 = vst [vmem:[#allocation5 + $0x470] sm:$0xff] %v1537_v23  ;;  %1685 = vst [vmem:[#allocation5 + $0x478] sm:$0xff] %v1538_v14  ;;  %v1531_v6 = vadd.f32 %v1388_v2, %v1258_v22  ;;  %v1532_v50 = vadd.f32 %v1388_v2, %v1259_v27  ;;  %v1533_v28 = vadd.f32 %v1388_v2, %v1260_v0 }
 0x28e   :  { %1686 = vst [vmem:[#allocation5 + $0x480] sm:$0xff] %v1539_v62  ;;  %1687 = vst [vmem:[#allocation5 + $0x488] sm:$0xff] %v1540_v36  ;;  %v1534_v59 = vadd.f32 %v1388_v2, %v1261_v42 }
 0x28f   :  { %1688 = vst.msk [vmem:[#allocation5 + $0x490] sm:$0xff] %vm181_vm0, %v1541_v55  ;;  %1675 = vst [vmem:[#allocation5 + $0x428] sm:$0xff] %v1528_v40 }
 0x290   :  { %1676 = vst [vmem:[#allocation5 + $0x430] sm:$0xff] %v1529_v57  ;;  %1677 = vst [vmem:[#allocation5 + $0x438] sm:$0xff] %v1530_v39 }
 0x291   :  { %1678 = vst [vmem:[#allocation5 + $0x440] sm:$0xff] %v1531_v6  ;;  %1679 = vst [vmem:[#allocation5 + $0x448] sm:$0xff] %v1532_v50 }
 0x292   :  { %1680 = vst [vmem:[#allocation5 + $0x450] sm:$0xff] %v1533_v28  ;;  %1681 = vst.msk [vmem:[#allocation5 + $0x458] sm:$0xff] %vm181_vm0, %v1534_v59 }
 0x293   :  { %1793 = shalt.err (!%p1790_p9)
}
 0x294   :  { %1700 = dma.vmem_to_hbm [thread:$0]  %s1695_s23, 18816, %s3663_s3, [#allocation4], %s1807_s15, %s1807_s15, %s1808_s16  }
 0x295   :  { %1804 = dma.done.wait [#allocation4], 18816  }
 0x296   :  { %1805 = vsyncadd [#allocation4], 4294948480 }
 0x297   :  { %1704 = vsyncpa [#allocation3], 1 }
 0x298   :  { %1705 = vsyncpa [#allocation4], 1 }

</bundles_post_ra>
